<compile_context>
chip_gen: v5e
topology: v5e:2x2
jax: 0.10.0
libtpu: 0.0.40
codegen_flags: <defaults>
</compile_context>

<pallas_src>
import jax
import jax.numpy as jnp
from jax.experimental import pallas as pl
from jax.experimental.pallas import tpu as pltpu

OUT_PAD = 128  # lane-dense padded width of the final (32 -> 1) layer


def _disc_kernel(x_ref,
                 w1_ref, b1_ref,
                 w2_ref, b2_ref,
                 w3_ref, b3_ref,
                 w4_ref, b4_ref,
                 w5_ref, b5_ref,
                 wo_ref, bo_ref,
                 out_ref):
    """Fused MLP forward on one batch tile: 5x (Linear + ReLU) + final Linear.

    Weights/activations are bf16; accumulation is fp32 on the MXU.
    """
    h = x_ref[...]  # bf16 (TILE_B, 1024); cast done once in the wrapper

    def linear_relu(h, w_ref, b_ref):
        y = jnp.dot(h, w_ref[...], preferred_element_type=jnp.float32)
        y = jnp.maximum(y + b_ref[...], 0.0)  # bias (1, out) broadcasts over rows
        return y.astype(jnp.bfloat16)

    h = linear_relu(h, w1_ref, b1_ref)
    h = linear_relu(h, w2_ref, b2_ref)
    h = linear_relu(h, w3_ref, b3_ref)
    h = linear_relu(h, w4_ref, b4_ref)
    h = linear_relu(h, w5_ref, b5_ref)

    # Final layer: output padded to 128 lanes (columns 1..127 have zero
    # weights/bias) so the store is a full-lane vst; real logit is column 0.
    y = jnp.dot(h, wo_ref[...], preferred_element_type=jnp.float32) + bo_ref[...]
    out_ref[...] = y


def discriminator_forward(x, params):
    """x: (B, C, H, W) float32. params: list of (W, b), W = (in, out), b = (1, out)."""
    B = x.shape[0]
    x_flat = x.reshape(B, -1)  # == torch.flatten(x, 1) for NCHW row-major
    in_dim = x_flat.shape[1]

    def round_up(n, m):
        return ((n + m - 1) // m) * m

    # MXU-friendly 256-row tiles for large batches; pad tiny batches to a
    # sublane multiple and run a single grid step.
    tile_b = 256 if B >= 256 else round_up(B, 8)
    b_pad = round_up(B, tile_b)

    x_bf16 = x_flat.astype(jnp.bfloat16)
    if b_pad != B:
        x_bf16 = jnp.pad(x_bf16, ((0, b_pad - B), (0, 0)))

    # Weights -> bf16 (cast once here, not per grid step); biases stay fp32
    # since they are added to the fp32 accumulator.
    flat_args = []
    in_specs = [pl.BlockSpec((tile_b, in_dim), lambda i: (i, 0))]
    n_layers = len(params)
    for li, (w, b) in enumerate(params):
        w = w.astype(jnp.bfloat16)
        b = b.astype(jnp.float32)
        if li == n_layers - 1:
            w = jnp.pad(w, ((0, 0), (0, OUT_PAD - w.shape[1])))
            b = jnp.pad(b, ((0, 0), (0, OUT_PAD - b.shape[1])))
        flat_args += [w, b]
        in_specs += [
            pl.BlockSpec(w.shape, lambda i: (0, 0)),  # constant index -> VMEM-resident
            pl.BlockSpec(b.shape, lambda i: (0, 0)),
        ]

    grid = (b_pad // tile_b,)

    flops = 2 * b_pad * (in_dim * 512 + 512 * 256 + 256 * 128
                         + 128 * 64 + 64 * 32 + 32 * OUT_PAD)
    bytes_accessed = (sum(int(a.size) * a.dtype.itemsize for a in flat_args)
                      + int(x_bf16.size) * 2 + b_pad * OUT_PAD * 4)

    out = pl.pallas_call(
        _disc_kernel,
        out_shape=jax.ShapeDtypeStruct((b_pad, OUT_PAD), jnp.float32),
        grid=grid,
        in_specs=in_specs,
        out_specs=pl.BlockSpec((tile_b, OUT_PAD), lambda i: (i, 0)),
        compiler_params=pltpu.CompilerParams(
            dimension_semantics=("parallel",)),
        cost_estimate=pl.CostEstimate(
            flops=flops, transcendentals=0, bytes_accessed=bytes_accessed),
    )(x_bf16, *flat_args)

    return out[:B, :1]


def init_params(key, input_dim):
    """Deterministic init mimicking PyTorch nn.Linear default (uniform +-1/sqrt(fan_in))."""
    dims = [input_dim, 512, 256, 128, 64, 32, 1]
    params = []
    for i in range(len(dims) - 1):
        fan_in, fan_out = dims[i], dims[i + 1]
        key, kw, kb = jax.random.split(key, 3)
        bound = 1.0 / (fan_in ** 0.5)
        w = jax.random.uniform(kw, (fan_in, fan_out), jnp.float32,
                               minval=-bound, maxval=bound)
        b = jax.random.uniform(kb, (1, fan_out), jnp.float32,
                               minval=-bound, maxval=bound)
        params.append((w, b))
    return params


def reference_forward(x, params):
    """Plain-JAX reference mirroring the kernel's bf16-compute / fp32-accumulate."""
    h = x.reshape(x.shape[0], -1).astype(jnp.bfloat16)
    n = len(params)
    for i, (w, b) in enumerate(params):
        y = jnp.dot(h, w.astype(jnp.bfloat16),
                    preferred_element_type=jnp.float32) + b.astype(jnp.float32)
        if i < n - 1:
            h = jnp.maximum(y, 0.0).astype(jnp.bfloat16)
        else:
            h = y
    return h


if __name__ == "__main__":
    key = jax.random.PRNGKey(0)
    k_x, k_p = jax.random.split(key)

    # small image-like input; flattens to input_dim = 1024
    B, C, H, W = 2, 4, 16, 16
    input_dim = C * H * W
    x = jax.random.normal(k_x, (B, C, H, W), jnp.float32)

    params = init_params(k_p, input_dim)

    out = discriminator_forward(x, params)
    out = jax.block_until_ready(out)

    ref = reference_forward(x, params)
    assert out.shape == (B, 1), out.shape
    assert jnp.allclose(out, ref, atol=1e-2, rtol=1e-2), (out, ref)

    print("KERNEL_OK")
</pallas_src>

<mosaic_0001>
module attributes {stable_mosaic.version = 11 : i64} {
  func.func @_disc_kernel(%arg0: i32, %arg1: memref<8x1024xbf16, #tpu.memory_space<vmem>>, %arg2: memref<1024x512xbf16, #tpu.memory_space<vmem>>, %arg3: memref<1x512xf32, #tpu.memory_space<vmem>>, %arg4: memref<512x256xbf16, #tpu.memory_space<vmem>>, %arg5: memref<1x256xf32, #tpu.memory_space<vmem>>, %arg6: memref<256x128xbf16, #tpu.memory_space<vmem>>, %arg7: memref<1x128xf32, #tpu.memory_space<vmem>>, %arg8: memref<128x64xbf16, #tpu.memory_space<vmem>>, %arg9: memref<1x64xf32, #tpu.memory_space<vmem>>, %arg10: memref<64x32xbf16, #tpu.memory_space<vmem>>, %arg11: memref<1x32xf32, #tpu.memory_space<vmem>>, %arg12: memref<32x128xbf16, #tpu.memory_space<vmem>>, %arg13: memref<1x128xf32, #tpu.memory_space<vmem>>, %arg14: memref<8x128xf32, #tpu.memory_space<vmem>>) attributes {dimension_semantics = [#tpu.dimension_semantics<parallel>], iteration_bounds = array<i64: 1>, scalar_prefetch = 0 : i64, scratch_operands = 0 : i64, tpu.core_type = #tpu.core_type<tc>, window_params = [{transform_indices = @transform_0, window_bounds = array<i64: 8, 1024>}, {pipeline_mode = #tpu.pipeline_mode<synchronous>, transform_indices = @transform_1, window_bounds = array<i64: 1024, 512>}, {pipeline_mode = #tpu.pipeline_mode<synchronous>, transform_indices = @transform_2, window_bounds = array<i64: 1, 512>}, {pipeline_mode = #tpu.pipeline_mode<synchronous>, transform_indices = @transform_3, window_bounds = array<i64: 512, 256>}, {pipeline_mode = #tpu.pipeline_mode<synchronous>, transform_indices = @transform_4, window_bounds = array<i64: 1, 256>}, {pipeline_mode = #tpu.pipeline_mode<synchronous>, transform_indices = @transform_5, window_bounds = array<i64: 256, 128>}, {pipeline_mode = #tpu.pipeline_mode<synchronous>, transform_indices = @transform_6, window_bounds = array<i64: 1, 128>}, {pipeline_mode = #tpu.pipeline_mode<synchronous>, transform_indices = @transform_7, window_bounds = array<i64: 128, 64>}, {pipeline_mode = #tpu.pipeline_mode<synchronous>, transform_indices = @transform_8, window_bounds = array<i64: 1, 64>}, {pipeline_mode = #tpu.pipeline_mode<synchronous>, transform_indices = @transform_9, window_bounds = array<i64: 64, 32>}, {pipeline_mode = #tpu.pipeline_mode<synchronous>, transform_indices = @transform_10, window_bounds = array<i64: 1, 32>}, {pipeline_mode = #tpu.pipeline_mode<synchronous>, transform_indices = @transform_11, window_bounds = array<i64: 32, 128>}, {pipeline_mode = #tpu.pipeline_mode<synchronous>, transform_indices = @transform_12, window_bounds = array<i64: 1, 128>}, {transform_indices = @transform_13, window_bounds = array<i64: 8, 128>}]} {
    %c0 = arith.constant 0 : index
    %c0_0 = arith.constant 0 : index
    %0 = vector.load %arg1[%c0, %c0_0] : memref<8x1024xbf16, #tpu.memory_space<vmem>>, vector<8x1024xbf16>
    %c0_1 = arith.constant 0 : index
    %c0_2 = arith.constant 0 : index
    %1 = vector.load %arg2[%c0_1, %c0_2] : memref<1024x512xbf16, #tpu.memory_space<vmem>>, vector<1024x512xbf16>
    %cst = arith.constant dense<0.000000e+00> : vector<8x512xf32>
    %2 = tpu.matmul %0, %1, %cst {dimension_numbers = #tpu.dot_dimension_numbers<[1], [0], [0], [1], [0, 0, 1, 1], [], []>} : vector<8x1024xbf16>, vector<1024x512xbf16>, vector<8x512xf32> -> vector<8x512xf32>
    %c0_3 = arith.constant 0 : index
    %c0_4 = arith.constant 0 : index
    %3 = vector.load %arg3[%c0_3, %c0_4] : memref<1x512xf32, #tpu.memory_space<vmem>>, vector<1x512xf32>
    %4 = vector.broadcast %3 : vector<1x512xf32> to vector<8x512xf32>
    %5 = arith.addf %2, %4 : vector<8x512xf32>
    %cst_5 = arith.constant 0.000000e+00 : f32
    %6 = vector.broadcast %cst_5 : f32 to vector<8x512xf32>
    %7 = arith.maximumf %5, %6 : vector<8x512xf32>
    %8 = arith.truncf %7 : vector<8x512xf32> to vector<8x512xbf16>
    %c0_6 = arith.constant 0 : index
    %c0_7 = arith.constant 0 : index
    %9 = vector.load %arg4[%c0_6, %c0_7] : memref<512x256xbf16, #tpu.memory_space<vmem>>, vector<512x256xbf16>
    %cst_8 = arith.constant dense<0.000000e+00> : vector<8x256xf32>
    %10 = tpu.matmul %8, %9, %cst_8 {dimension_numbers = #tpu.dot_dimension_numbers<[1], [0], [0], [1], [0, 0, 1, 1], [], []>} : vector<8x512xbf16>, vector<512x256xbf16>, vector<8x256xf32> -> vector<8x256xf32>
    %c0_9 = arith.constant 0 : index
    %c0_10 = arith.constant 0 : index
    %11 = vector.load %arg5[%c0_9, %c0_10] : memref<1x256xf32, #tpu.memory_space<vmem>>, vector<1x256xf32>
    %12 = vector.broadcast %11 : vector<1x256xf32> to vector<8x256xf32>
    %13 = arith.addf %10, %12 : vector<8x256xf32>
    %cst_11 = arith.constant 0.000000e+00 : f32
    %14 = vector.broadcast %cst_11 : f32 to vector<8x256xf32>
    %15 = arith.maximumf %13, %14 : vector<8x256xf32>
    %16 = arith.truncf %15 : vector<8x256xf32> to vector<8x256xbf16>
    %c0_12 = arith.constant 0 : index
    %c0_13 = arith.constant 0 : index
    %17 = vector.load %arg6[%c0_12, %c0_13] : memref<256x128xbf16, #tpu.memory_space<vmem>>, vector<256x128xbf16>
    %cst_14 = arith.constant dense<0.000000e+00> : vector<8x128xf32>
    %18 = tpu.matmul %16, %17, %cst_14 {dimension_numbers = #tpu.dot_dimension_numbers<[1], [0], [0], [1], [0, 0, 1, 1], [], []>} : vector<8x256xbf16>, vector<256x128xbf16>, vector<8x128xf32> -> vector<8x128xf32>
    %c0_15 = arith.constant 0 : index
    %c0_16 = arith.constant 0 : index
    %19 = vector.load %arg7[%c0_15, %c0_16] : memref<1x128xf32, #tpu.memory_space<vmem>>, vector<1x128xf32>
    %20 = vector.broadcast %19 : vector<1x128xf32> to vector<8x128xf32>
    %21 = arith.addf %18, %20 : vector<8x128xf32>
    %cst_17 = arith.constant 0.000000e+00 : f32
    %22 = vector.broadcast %cst_17 : f32 to vector<8x128xf32>
    %23 = arith.maximumf %21, %22 : vector<8x128xf32>
    %24 = arith.truncf %23 : vector<8x128xf32> to vector<8x128xbf16>
    %c0_18 = arith.constant 0 : index
    %c0_19 = arith.constant 0 : index
    %25 = vector.load %arg8[%c0_18, %c0_19] : memref<128x64xbf16, #tpu.memory_space<vmem>>, vector<128x64xbf16>
    %cst_20 = arith.constant dense<0.000000e+00> : vector<8x64xf32>
    %26 = tpu.matmul %24, %25, %cst_20 {dimension_numbers = #tpu.dot_dimension_numbers<[1], [0], [0], [1], [0, 0, 1, 1], [], []>} : vector<8x128xbf16>, vector<128x64xbf16>, vector<8x64xf32> -> vector<8x64xf32>
    %c0_21 = arith.constant 0 : index
    %c0_22 = arith.constant 0 : index
    %27 = vector.load %arg9[%c0_21, %c0_22] : memref<1x64xf32, #tpu.memory_space<vmem>>, vector<1x64xf32>
    %28 = vector.broadcast %27 : vector<1x64xf32> to vector<8x64xf32>
    %29 = arith.addf %26, %28 : vector<8x64xf32>
    %cst_23 = arith.constant 0.000000e+00 : f32
    %30 = vector.broadcast %cst_23 : f32 to vector<8x64xf32>
    %31 = arith.maximumf %29, %30 : vector<8x64xf32>
    %32 = arith.truncf %31 : vector<8x64xf32> to vector<8x64xbf16>
    %c0_24 = arith.constant 0 : index
    %c0_25 = arith.constant 0 : index
    %33 = vector.load %arg10[%c0_24, %c0_25] : memref<64x32xbf16, #tpu.memory_space<vmem>>, vector<64x32xbf16>
    %cst_26 = arith.constant dense<0.000000e+00> : vector<8x32xf32>
    %34 = tpu.matmul %32, %33, %cst_26 {dimension_numbers = #tpu.dot_dimension_numbers<[1], [0], [0], [1], [0, 0, 1, 1], [], []>} : vector<8x64xbf16>, vector<64x32xbf16>, vector<8x32xf32> -> vector<8x32xf32>
    %c0_27 = arith.constant 0 : index
    %c0_28 = arith.constant 0 : index
    %35 = vector.load %arg11[%c0_27, %c0_28] : memref<1x32xf32, #tpu.memory_space<vmem>>, vector<1x32xf32>
    %36 = vector.broadcast %35 : vector<1x32xf32> to vector<8x32xf32>
    %37 = arith.addf %34, %36 : vector<8x32xf32>
    %cst_29 = arith.constant 0.000000e+00 : f32
    %38 = vector.broadcast %cst_29 : f32 to vector<8x32xf32>
    %39 = arith.maximumf %37, %38 : vector<8x32xf32>
    %40 = arith.truncf %39 : vector<8x32xf32> to vector<8x32xbf16>
    %c0_30 = arith.constant 0 : index
    %c0_31 = arith.constant 0 : index
    %41 = vector.load %arg12[%c0_30, %c0_31] : memref<32x128xbf16, #tpu.memory_space<vmem>>, vector<32x128xbf16>
    %cst_32 = arith.constant dense<0.000000e+00> : vector<8x128xf32>
    %42 = tpu.matmul %40, %41, %cst_32 {dimension_numbers = #tpu.dot_dimension_numbers<[1], [0], [0], [1], [0, 0, 1, 1], [], []>} : vector<8x32xbf16>, vector<32x128xbf16>, vector<8x128xf32> -> vector<8x128xf32>
    %c0_33 = arith.constant 0 : index
    %c0_34 = arith.constant 0 : index
    %43 = vector.load %arg13[%c0_33, %c0_34] : memref<1x128xf32, #tpu.memory_space<vmem>>, vector<1x128xf32>
    %44 = vector.broadcast %43 : vector<1x128xf32> to vector<8x128xf32>
    %45 = arith.addf %42, %44 : vector<8x128xf32>
    %c0_35 = arith.constant 0 : index
    %c0_36 = arith.constant 0 : index
    %46 = vector.load %arg14[%c0_35, %c0_36] : memref<8x128xf32, #tpu.memory_space<vmem>>, vector<8x128xf32>
    tpu.vector_store %arg14[%c0_35, %c0_36], %45 {strides = array<i32>} : memref<8x128xf32, #tpu.memory_space<vmem>>, vector<8x128xf32>,
    return
  }
  func.func @transform_0(%arg0: i32) -> (i32, i32) {
    %c0_i32 = arith.constant 0 : i32
    %c0_i32_0 = arith.constant 0 : i32
    return %arg0, %c0_i32 : i32, i32
  }
  func.func @transform_1(%arg0: i32) -> (i32, i32) {
    %c0_i32 = arith.constant 0 : i32
    %c0_i32_0 = arith.constant 0 : i32
    %c0_i32_1 = arith.constant 0 : i32
    return %c0_i32, %c0_i32_0 : i32, i32
  }
  func.func @transform_2(%arg0: i32) -> (i32, i32) {
    %c0_i32 = arith.constant 0 : i32
    %c0_i32_0 = arith.constant 0 : i32
    %c0_i32_1 = arith.constant 0 : i32
    return %c0_i32, %c0_i32_0 : i32, i32
  }
  func.func @transform_3(%arg0: i32) -> (i32, i32) {
    %c0_i32 = arith.constant 0 : i32
    %c0_i32_0 = arith.constant 0 : i32
    %c0_i32_1 = arith.constant 0 : i32
    return %c0_i32, %c0_i32_0 : i32, i32
  }
  func.func @transform_4(%arg0: i32) -> (i32, i32) {
    %c0_i32 = arith.constant 0 : i32
    %c0_i32_0 = arith.constant 0 : i32
    %c0_i32_1 = arith.constant 0 : i32
    return %c0_i32, %c0_i32_0 : i32, i32
  }
  func.func @transform_5(%arg0: i32) -> (i32, i32) {
    %c0_i32 = arith.constant 0 : i32
    %c0_i32_0 = arith.constant 0 : i32
    %c0_i32_1 = arith.constant 0 : i32
    return %c0_i32, %c0_i32_0 : i32, i32
  }
  func.func @transform_6(%arg0: i32) -> (i32, i32) {
    %c0_i32 = arith.constant 0 : i32
    %c0_i32_0 = arith.constant 0 : i32
    %c0_i32_1 = arith.constant 0 : i32
    return %c0_i32, %c0_i32_0 : i32, i32
  }
  func.func @transform_7(%arg0: i32) -> (i32, i32) {
    %c0_i32 = arith.constant 0 : i32
    %c0_i32_0 = arith.constant 0 : i32
    %c0_i32_1 = arith.constant 0 : i32
    return %c0_i32, %c0_i32_0 : i32, i32
  }
  func.func @transform_8(%arg0: i32) -> (i32, i32) {
    %c0_i32 = arith.constant 0 : i32
    %c0_i32_0 = arith.constant 0 : i32
    %c0_i32_1 = arith.constant 0 : i32
    return %c0_i32, %c0_i32_0 : i32, i32
  }
  func.func @transform_9(%arg0: i32) -> (i32, i32) {
    %c0_i32 = arith.constant 0 : i32
    %c0_i32_0 = arith.constant 0 : i32
    %c0_i32_1 = arith.constant 0 : i32
    return %c0_i32, %c0_i32_0 : i32, i32
  }
  func.func @transform_10(%arg0: i32) -> (i32, i32) {
    %c0_i32 = arith.constant 0 : i32
    %c0_i32_0 = arith.constant 0 : i32
    %c0_i32_1 = arith.constant 0 : i32
    return %c0_i32, %c0_i32_0 : i32, i32
  }
  func.func @transform_11(%arg0: i32) -> (i32, i32) {
    %c0_i32 = arith.constant 0 : i32
    %c0_i32_0 = arith.constant 0 : i32
    %c0_i32_1 = arith.constant 0 : i32
    return %c0_i32, %c0_i32_0 : i32, i32
  }
  func.func @transform_12(%arg0: i32) -> (i32, i32) {
    %c0_i32 = arith.constant 0 : i32
    %c0_i32_0 = arith.constant 0 : i32
    %c0_i32_1 = arith.constant 0 : i32
    return %c0_i32, %c0_i32_0 : i32, i32
  }
  func.func @transform_13(%arg0: i32) -> (i32, i32) {
    %c0_i32 = arith.constant 0 : i32
    %c0_i32_0 = arith.constant 0 : i32
    return %arg0, %c0_i32 : i32, i32
  }
}

</mosaic_0001>

<bundles_post_ra>
// kernel: tpu_custom_call.1
= control target key start
LH: loop header
LB: loop body
LE: loop exit
PB: predicated region body
PF: predicated region fallthrough
CT: control target
= control target key end

     0   :  { %18 = vsyncpa [#allocation3], 0  ;;  %s5141_s0 = inlined_call_operand.hbm [shape: bf16[8,1024], index: 0, kind: input, shape index: {}]   ;;  %s5142_s1 = inlined_call_operand.hbm [shape: bf16[1024,512], index: 1, kind: input, shape index: {}]   ;;  %s5143_s2 = inlined_call_operand.vmem [shape: f32[1,512], index: 2, kind: input, shape index: {}]   ;;  %s5144_s3 = inlined_call_operand.hbm [shape: bf16[512,256], index: 3, kind: input, shape index: {}]   ;;  %s5145_s4 = inlined_call_operand.hbm [shape: f32[1,256], index: 4, kind: input, shape index: {}]   ;;  %s5146_s5 = inlined_call_operand.vmem [shape: bf16[256,128], index: 5, kind: input, shape index: {}]   ;;  %s5147_s6 = inlined_call_operand.vmem [shape: f32[1,128], index: 6, kind: input, shape index: {}]   ;;  %s5148_s7 = inlined_call_operand.vmem [shape: bf16[128,64], index: 7, kind: input, shape index: {}]   ;;  %s5149_s8 = inlined_call_operand.vmem [shape: f32[1,64], index: 8, kind: input, shape index: {}]   ;;  %s5150_s9 = inlined_call_operand.vmem [shape: bf16[64,32], index: 9, kind: input, shape index: {}]   ;;  %s5151_s10 = inlined_call_operand.vmem [shape: f32[1,32], index: 10, kind: input, shape index: {}]   ;;  %s5152_s11 = inlined_call_operand.vmem [shape: bf16[32,128], index: 11, kind: input, shape index: {}]   ;;  %s5153_s12 = inlined_call_operand.vmem [shape: f32[1,128], index: 12, kind: input, shape index: {}]   ;;  %s5154_s13 = inlined_call_operand.hbm [shape: f32[8,128], index: 13, kind: output, shape index: {}]  }
   0x1   :  { %19 = vsyncpa [#allocation6], 0 }
   0x2   :  { %20 = vsyncpa [#allocation9], 0  ;;  %s37_s27 = sshll.u32 %s5142_s1, 4  ;;  %s38_s27 = int_to_ptr.hbm [resolvable:$true] %s37_s27 }
   0x3   :  { %21 = vsyncpa [#allocation4], 0  ;;  %s4854_s28 = smov [#allocation5]   ;;  %s27_s15 = sshll.u32 %s5141_s0, 4  ;;  %s28_s15 = int_to_ptr.hbm [resolvable:$true] %s27_s15 }
   0x4   :  { %s39_s29 = sshll.u32 %s4854_s28, 4  ;;  %s4855_s16 = smov 256   ;;  %s40_s29 = int_to_ptr.vmem [resolvable:$true] %s39_s29 }
   0x5   :  { %s4856_s17 = smov 16   ;;  %s4857_s18 = smov [#allocation2]  }
   0x6   :  { %45 = dma.hbm_to_vmem [thread:$0]  %s38_s27, 32768, %s40_s29, [#allocation6], %s4855_s16, %s4855_s16, %s4856_s17  }
   0x7   :  { %s29_s19 = sshll.u32 %s4857_s18, 4  ;;  %s52_s22 = sshll.u32 %s5144_s3, 4  ;;  %s30_s19 = int_to_ptr.vmem [resolvable:$true] %s29_s19  ;;  %s53_s22 = int_to_ptr.hbm [resolvable:$true] %s52_s22 }
   0x8   :  { %32 = dma.hbm_to_vmem [thread:$0]  %s28_s15, 512, %s30_s19, [#allocation3]  }
   0x9   :  { %s4858_s1 = smov [#allocation7]   ;;  %s66_s0 = sshll.u32 %s5145_s4, 4  ;;  %s67_s0 = int_to_ptr.hbm [resolvable:$true] %s66_s0 }
   0xa   :  { %s54_s23 = sshll.u32 %s4858_s1, 4  ;;  %s4859_s26 = smov 128   ;;  %s55_s23 = int_to_ptr.vmem [resolvable:$true] %s54_s23 }
   0xb   :  { %s4860_s28 = smov 8   ;;  %s4861_s27 = smov [#allocation8]  }
   0xc   :  { %60 = dma.hbm_to_vmem [thread:$0]  %s53_s22, 8192, %s55_s23, [#allocation6], %s4859_s26, %s4859_s26, %s4860_s28  }
   0xd   :  { %s68_s29 = sshll.u32 %s4861_s27, 4  ;;  %s69_s29 = int_to_ptr.vmem [resolvable:$true] %s68_s29 }
   0xe   :  { %71 = dma.hbm_to_vmem [thread:$0]  %s67_s0, 32, %s69_s29, [#allocation9]  }
   0xf   :  { %4846 = dma.done.wait [#allocation3], 512  }
  0x10   :  { %4847 = vsyncadd [#allocation3], 4294966784 }
  0x11   :  { %4848 = dma.done.wait [#allocation6], 40960  }
  0x12   :  { %4849 = vsyncadd [#allocation6], 4294926336 }
  0x13   :  { %4850 = dma.done.wait [#allocation9], 32  }
  0x14   :  { %4851 = vsyncadd [#allocation9], 4294967264  ;;  %v3074_v0 = vld [vmem:[#allocation5 + $0xe0] sm:$0xf]  ;;  %v4392_v1 = vld [vmem:[#allocation5 + $0xec] sm:$0xf0] }
  0x15   :  { %v3202_v2 = vld [vmem:[#allocation5 + $0x1e0] sm:$0xf]  ;;  %v3075_v3 = vor.u32 %v4392_v1, %v3074_v0  ;;  %v4424_v4 = vld [vmem:[#allocation5 + $0x1ec] sm:$0xf0]  ;;  %vm2884_vm0 = vcmask 523264   ;;  %vm2923_vm1 = vcmask 261120  }
  0x16   :  { %v3330_v5 = vld [vmem:[#allocation5 + $0x2e0] sm:$0xf]  ;;  %v4456_v6 = vld [vmem:[#allocation5 + $0x2ec] sm:$0xf0]  ;;  %v3203_v7 = vor.u32 %v4424_v4, %v3202_v2  ;;  %s4862_s29 = smov [#allocation10]   ;;  %s2948_s14 = sshll.u32 %s5154_s13, 4  ;;  %s2949_s14 = int_to_ptr.hbm [resolvable:$true] %s2948_s14 }
  0x17   :  { %v3331_v8 = vor.u32 %v4456_v6, %v3330_v5  ;;  %v3458_v9 = vld [vmem:[#allocation5 + $0x3e0] sm:$0xf]  ;;  %v4488_v10 = vld [vmem:[#allocation5 + $0x3ec] sm:$0xf0]  ;;  %1683 = vmatpush.bf16.msra.mxu0 %v3075_v3  ;;  %s2946_s3 = sshll.u32 %s4862_s29, 4  ;;  %s2947_s3 = int_to_ptr.vmem [resolvable:$true] %s2946_s3 }
  0x18   :  { %v3058_v11 = vld [vmem:[#allocation5 + $0xc0] sm:$0xf]  ;;  %v3459_v12 = vor.u32 %v4488_v10, %v3458_v9  ;;  %v4388_v13 = vld [vmem:[#allocation5 + $0xcc] sm:$0xf0]  ;;  %1696 = vmatpush.bf16.msra.mxu1 %v3203_v7 }
  0x19   :  { %v3186_v14 = vld [vmem:[#allocation5 + $0x1c0] sm:$0xf]  ;;  %v4420_v15 = vld [vmem:[#allocation5 + $0x1cc] sm:$0xf0]  ;;  %1709 = vmatpush.bf16.msra.mxu2 %v3331_v8  ;;  %v3059_v16 = vor.u32 %v4388_v13, %v3058_v11 }
  0x1a   :  { %v3187_v17 = vor.u32 %v4420_v15, %v3186_v14  ;;  %v3314_v18 = vld [vmem:[#allocation5 + $0x2c0] sm:$0xf]  ;;  %v4452_v19 = vld [vmem:[#allocation5 + $0x2cc] sm:$0xf0]  ;;  %1722 = vmatpush.bf16.msra.mxu3 %v3459_v12 }
  0x1b   :  { %v3442_v20 = vld [vmem:[#allocation5 + $0x3c0] sm:$0xf]  ;;  %v3315_v21 = vor.u32 %v4452_v19, %v3314_v18  ;;  %v4484_v22 = vld [vmem:[#allocation5 + $0x3cc] sm:$0xf0]  ;;  %1684 = vmatpush.bf16.msra.mxu0 %v3059_v16 }
  0x1c   :  { %v3042_v23 = vld [vmem:[#allocation5 + $0xa0] sm:$0xf]  ;;  %v4384_v24 = vld [vmem:[#allocation5 + $0xac] sm:$0xf0]  ;;  %v3443_v25 = vor.u32 %v4484_v22, %v3442_v20  ;;  %1697 = vmatpush.bf16.msra.mxu1 %v3187_v17 }
  0x1d   :  { %v3170_v26 = vld [vmem:[#allocation5 + $0x1a0] sm:$0xf]  ;;  %v4416_v27 = vld [vmem:[#allocation5 + $0x1ac] sm:$0xf0]  ;;  %v3043_v29 = vor.u32 %v4384_v24, %v3042_v23  ;;  %1710 = vmatpush.bf16.msra.mxu2 %v3315_v21 }
  0x1e   :  { %v3298_v28 = vld [vmem:[#allocation5 + $0x2a0] sm:$0xf]  ;;  %v4448_v30 = vld [vmem:[#allocation5 + $0x2ac] sm:$0xf0]  ;;  %v3171_v33 = vor.u32 %v4416_v27, %v3170_v26  ;;  %1723 = vmatpush.bf16.msra.mxu3 %v3443_v25 }
  0x1f   :  { %v3426_v31 = vld [vmem:[#allocation5 + $0x3a0] sm:$0xf]  ;;  %v4480_v32 = vld [vmem:[#allocation5 + $0x3ac] sm:$0xf0]  ;;  %v3299_v34 = vor.u32 %v4448_v30, %v3298_v28  ;;  %1685 = vmatpush.bf16.msra.mxu0 %v3043_v29 }
  0x20   :  { %v3026_v35 = vld [vmem:[#allocation5 + $0x80] sm:$0xf]  ;;  %v4380_v36 = vld [vmem:[#allocation5 + $0x8c] sm:$0xf0]  ;;  %v3427_v38 = vor.u32 %v4480_v32, %v3426_v31  ;;  %1698 = vmatpush.bf16.msra.mxu1 %v3171_v33 }
  0x21   :  { %v3154_v37 = vld [vmem:[#allocation5 + $0x180] sm:$0xf]  ;;  %v4412_v39 = vld [vmem:[#allocation5 + $0x18c] sm:$0xf0]  ;;  %v3027_v44 = vor.u32 %v4380_v36, %v3026_v35  ;;  %1711 = vmatpush.bf16.msra.mxu2 %v3299_v34 }
  0x22   :  { %v3282_v40 = vld [vmem:[#allocation5 + $0x280] sm:$0xf]  ;;  %v4444_v41 = vld [vmem:[#allocation5 + $0x28c] sm:$0xf0]  ;;  %v3155_v45 = vor.u32 %v4412_v39, %v3154_v37  ;;  %1724 = vmatpush.bf16.msra.mxu3 %v3427_v38 }
  0x23   :  { %v3410_v42 = vld [vmem:[#allocation5 + $0x380] sm:$0xf]  ;;  %v4476_v43 = vld [vmem:[#allocation5 + $0x38c] sm:$0xf0]  ;;  %v3283_v46 = vor.u32 %v4444_v41, %v3282_v40  ;;  %1686 = vmatpush.bf16.msra.mxu0 %v3027_v44 }
  0x24   :  { %v3010_v47 = vld [vmem:[#allocation5 + $0x60] sm:$0xf]  ;;  %v4376_v48 = vld [vmem:[#allocation5 + $0x6c] sm:$0xf0]  ;;  %v3411_v50 = vor.u32 %v4476_v43, %v3410_v42  ;;  %1699 = vmatpush.bf16.msra.mxu1 %v3155_v45 }
  0x25   :  { %v3138_v49 = vld [vmem:[#allocation5 + $0x160] sm:$0xf]  ;;  %v4408_v51 = vld [vmem:[#allocation5 + $0x16c] sm:$0xf0]  ;;  %v3011_v56 = vor.u32 %v4376_v48, %v3010_v47  ;;  %1712 = vmatpush.bf16.msra.mxu2 %v3283_v46 }
  0x26   :  { %v3266_v52 = vld [vmem:[#allocation5 + $0x260] sm:$0xf]  ;;  %v4440_v53 = vld [vmem:[#allocation5 + $0x26c] sm:$0xf0]  ;;  %v3139_v57 = vor.u32 %v4408_v51, %v3138_v49  ;;  %1725 = vmatpush.bf16.msra.mxu3 %v3411_v50 }
  0x27   :  { %v3394_v54 = vld [vmem:[#allocation5 + $0x360] sm:$0xf]  ;;  %v4472_v55 = vld [vmem:[#allocation5 + $0x36c] sm:$0xf0]  ;;  %v3267_v58 = vor.u32 %v4440_v53, %v3266_v52  ;;  %1687 = vmatpush.bf16.msra.mxu0 %v3011_v56 }
  0x28   :  { %v2994_v59 = vld [vmem:[#allocation5 + $0x40] sm:$0xf]  ;;  %v4372_v60 = vld [vmem:[#allocation5 + $0x4c] sm:$0xf0]  ;;  %v3395_v62 = vor.u32 %v4472_v55, %v3394_v54  ;;  %1700 = vmatpush.bf16.msra.mxu1 %v3139_v57 }
  0x29   :  { %v3122_v61 = vld [vmem:[#allocation5 + $0x140] sm:$0xf]  ;;  %v4404_v63 = vld [vmem:[#allocation5 + $0x14c] sm:$0xf0]  ;;  %v2995_v4 = vor.u32 %v4372_v60, %v2994_v59  ;;  %1713 = vmatpush.bf16.msra.mxu2 %v3267_v58 }
  0x2a   :  { %v3250_v0 = vld [vmem:[#allocation5 + $0x240] sm:$0xf]  ;;  %v4436_v1 = vld [vmem:[#allocation5 + $0x24c] sm:$0xf0]  ;;  %v3123_v5 = vor.u32 %v4404_v63, %v3122_v61  ;;  %1726 = vmatpush.bf16.msra.mxu3 %v3395_v62 }
  0x2b   :  { %v3378_v2 = vld [vmem:[#allocation5 + $0x340] sm:$0xf]  ;;  %v4468_v3 = vld [vmem:[#allocation5 + $0x34c] sm:$0xf0]  ;;  %v3251_v6 = vor.u32 %v4436_v1, %v3250_v0  ;;  %1688 = vmatpush.bf16.msra.mxu0 %v2995_v4 }
  0x2c   :  { %v2978_v7 = vld [vmem:[#allocation5 + $0x20] sm:$0xf]  ;;  %v4368_v8 = vld [vmem:[#allocation5 + $0x2c] sm:$0xf0]  ;;  %v3379_v10 = vor.u32 %v4468_v3, %v3378_v2  ;;  %1701 = vmatpush.bf16.msra.mxu1 %v3123_v5  ;;  %v106_v2 = vld [vmem:[#allocation2 + $0x8] sm:$0xff] }
  0x2d   :  { %v3106_v9 = vld [vmem:[#allocation5 + $0x120] sm:$0xf]  ;;  %v4400_v11 = vld [vmem:[#allocation5 + $0x12c] sm:$0xf0]  ;;  %v2979_v16 = vor.u32 %v4368_v8, %v2978_v7  ;;  %1714 = vmatpush.bf16.msra.mxu2 %v3251_v6  ;;  %v381_v8 = vunpack.c.l.b16 %v106_v2 }
  0x2e   :  { %v3234_v12 = vld [vmem:[#allocation5 + $0x220] sm:$0xf]  ;;  %v4432_v13 = vld [vmem:[#allocation5 + $0x22c] sm:$0xf0]  ;;  %v3107_v19 = vor.u32 %v4400_v11, %v3106_v9  ;;  %1727 = vmatpush.bf16.msra.mxu3 %v3379_v10  ;;  %v382_v10 = vunpack.c.h.b16 %v106_v2 }
  0x2f   :  { %v3362_v14 = vld [vmem:[#allocation5 + $0x320] sm:$0xf]  ;;  %v4464_v15 = vld [vmem:[#allocation5 + $0x32c] sm:$0xf0]  ;;  %v3235_v20 = vor.u32 %v4432_v13, %v3234_v12  ;;  %1689 = vmatpush.bf16.msra.mxu0 %v2979_v16 }
  0x30   :  { %v2962_v17 = vld [vmem:[#allocation5] sm:$0xf]  ;;  %v4364_v18 = vld [vmem:[#allocation5 + $0xc] sm:$0xf0]  ;;  %v3363_v24 = vor.u32 %v4464_v15, %v3362_v14  ;;  %1702 = vmatpush.bf16.msra.mxu1 %v3107_v19 }
  0x31   :  { %v3090_v21 = vld [vmem:[#allocation5 + $0x100] sm:$0xf]  ;;  %v4396_v22 = vld [vmem:[#allocation5 + $0x10c] sm:$0xf0]  ;;  %v2963_v31 = vor.u32 %v4364_v18, %v2962_v17  ;;  %1715 = vmatpush.bf16.msra.mxu2 %v3235_v20  ;;  %v4945_v18 = vpack.c.b16 %v381_v8, %v381_v8  ;;  %v4949_v20 = vpack.c.b16 %v382_v10, %v382_v10  ;;  %v4390_v8 = vld [vmem:[#allocation5 + $0xe4] sm:$0xf] }
  0x32   :  { %v3218_v23 = vld [vmem:[#allocation5 + $0x200] sm:$0xf]  ;;  %v4428_v25 = vld [vmem:[#allocation5 + $0x20c] sm:$0xf0]  ;;  %v3091_v35 = vor.u32 %v4396_v22, %v3090_v21  ;;  %1728 = vmatpush.bf16.msra.mxu3 %v3363_v24  ;;  %v4422_v10 = vld [vmem:[#allocation5 + $0x1e4] sm:$0xf] }
  0x33   :  { %v3346_v26 = vld [vmem:[#allocation5 + $0x300] sm:$0xf]  ;;  %v4460_v27 = vld [vmem:[#allocation5 + $0x30c] sm:$0xf0]  ;;  %v3219_v36 = vor.u32 %v4428_v25, %v3218_v23  ;;  %1690 = vmatpush.bf16.msra.mxu0 %v2963_v31 }
  0x34   :  { %v3586_v28 = vld [vmem:[#allocation5 + $0x4e0] sm:$0xf]  ;;  %v4520_v29 = vld [vmem:[#allocation5 + $0x4ec] sm:$0xf0]  ;;  %v3347_v39 = vor.u32 %v4460_v27, %v3346_v26  ;;  %1703 = vmatpush.bf16.msra.mxu1 %v3091_v35 }
  0x35   :  { %v3714_v30 = vld [vmem:[#allocation5 + $0x5e0] sm:$0xf]  ;;  %v4552_v32 = vld [vmem:[#allocation5 + $0x5ec] sm:$0xf0]  ;;  %v3587_v40 = vor.u32 %v4520_v29, %v3586_v28  ;;  %1716 = vmatpush.bf16.msra.mxu2 %v3219_v36 }
  0x36   :  { %v3842_v33 = vld [vmem:[#allocation5 + $0x6e0] sm:$0xf]  ;;  %v4584_v34 = vld [vmem:[#allocation5 + $0x6ec] sm:$0xf0]  ;;  %v3715_v41 = vor.u32 %v4552_v32, %v3714_v30  ;;  %1729 = vmatpush.bf16.msra.mxu3 %v3347_v39 }
  0x37   :  { %v3970_v37 = vld [vmem:[#allocation5 + $0x7e0] sm:$0xf]  ;;  %v4616_v38 = vld [vmem:[#allocation5 + $0x7ec] sm:$0xf0]  ;;  %v3843_v42 = vor.u32 %v4584_v34, %v3842_v33  ;;  %1735 = vmatpush.bf16.msrb.mxu0 %v3587_v40 }
  0x38   :  { %v3570_v43 = vld [vmem:[#allocation5 + $0x4c0] sm:$0xf]  ;;  %v4516_v44 = vld [vmem:[#allocation5 + $0x4cc] sm:$0xf0]  ;;  %v3971_v46 = vor.u32 %v4616_v38, %v3970_v37  ;;  %1748 = vmatpush.bf16.msrb.mxu1 %v3715_v41  ;;  %1717 = vmatmul.bf16.vlgmr.msra.gmra.mxu2 %v4945_v18 }
  0x39   :  { %v3698_v45 = vld [vmem:[#allocation5 + $0x5c0] sm:$0xf]  ;;  %v4548_v47 = vld [vmem:[#allocation5 + $0x5cc] sm:$0xf0]  ;;  %v3571_v52 = vor.u32 %v4516_v44, %v3570_v43  ;;  %1761 = vmatpush.bf16.msrb.mxu2 %v3843_v42  ;;  %1730 = vmatmul.bf16.vlgmr.msra.gmra.mxu3 %v4949_v20 }
  0x3a   :  { %v3826_v48 = vld [vmem:[#allocation5 + $0x6c0] sm:$0xf]  ;;  %v4580_v49 = vld [vmem:[#allocation5 + $0x6cc] sm:$0xf0]  ;;  %v3699_v54 = vor.u32 %v4548_v47, %v3698_v45  ;;  %1774 = vmatpush.bf16.msrb.mxu3 %v3971_v46 }
  0x3b   :  { %v3954_v50 = vld [vmem:[#allocation5 + $0x7c0] sm:$0xf]  ;;  %v4612_v51 = vld [vmem:[#allocation5 + $0x7cc] sm:$0xf0]  ;;  %v3827_v55 = vor.u32 %v4580_v49, %v3826_v48  ;;  %1736 = vmatpush.bf16.msrb.mxu0 %v3571_v52 }
  0x3c   :  { %v3554_v53 = vld [vmem:[#allocation5 + $0x4a0] sm:$0xf]  ;;  %v4512_v56 = vld [vmem:[#allocation5 + $0x4ac] sm:$0xf0]  ;;  %v3955_v59 = vor.u32 %v4612_v51, %v3954_v50  ;;  %1749 = vmatpush.bf16.msrb.mxu1 %v3699_v54 }
  0x3d   :  { %v3682_v57 = vld [vmem:[#allocation5 + $0x5a0] sm:$0xf]  ;;  %v4544_v58 = vld [vmem:[#allocation5 + $0x5ac] sm:$0xf0]  ;;  %v3555_v0 = vor.u32 %v4512_v56, %v3554_v53  ;;  %1762 = vmatpush.bf16.msrb.mxu2 %v3827_v55 }
  0x3e   :  { %v3810_v60 = vld [vmem:[#allocation5 + $0x6a0] sm:$0xf]  ;;  %v4576_v61 = vld [vmem:[#allocation5 + $0x6ac] sm:$0xf0]  ;;  %v3683_v1 = vor.u32 %v4544_v58, %v3682_v57  ;;  %1775 = vmatpush.bf16.msrb.mxu3 %v3955_v59 }
  0x3f   :  { %v3938_v62 = vld [vmem:[#allocation5 + $0x7a0] sm:$0xf]  ;;  %v4608_v63 = vld [vmem:[#allocation5 + $0x7ac] sm:$0xf0]  ;;  %v3811_v4 = vor.u32 %v4576_v61, %v3810_v60  ;;  %1737 = vmatpush.bf16.msrb.mxu0 %v3555_v0 }
  0x40   :  { %v105_v3 = vld [vmem:[#allocation2] sm:$0xff]  ;;  %v4508_v6 = vld [vmem:[#allocation5 + $0x48c] sm:$0xf0]  ;;  %v3939_v11 = vor.u32 %v4608_v63, %v3938_v62  ;;  %1750 = vmatpush.bf16.msrb.mxu1 %v3683_v1 }
  0x41   :  { %v3538_v5 = vld [vmem:[#allocation5 + $0x480] sm:$0xf]  ;;  %v379_v9 = vunpack.c.l.b16 %v105_v3  ;;  %v4540_v12 = vld [vmem:[#allocation5 + $0x58c] sm:$0xf0]  ;;  %v380_v15 = vunpack.c.h.b16 %v105_v3  ;;  %1763 = vmatpush.bf16.msrb.mxu2 %v3811_v4  ;;  %v108_v3 = vld [vmem:[#allocation2 + $0x18] sm:$0xff] }
  0x42   :  { %v3666_v7 = vld [vmem:[#allocation5 + $0x580] sm:$0xf]  ;;  %v4572_v14 = vld [vmem:[#allocation5 + $0x68c] sm:$0xf0]  ;;  %v3539_v21 = vor.u32 %v4508_v6, %v3538_v5  ;;  %1776 = vmatpush.bf16.msrb.mxu3 %v3939_v11 }
  0x43   :  { %v3794_v13 = vld [vmem:[#allocation5 + $0x680] sm:$0xf]  ;;  %v4604_v17 = vld [vmem:[#allocation5 + $0x78c] sm:$0xf0]  ;;  %v4947_v19 = vpack.c.b16 %v379_v9, %v379_v9  ;;  %v4951_v22 = vpack.c.b16 %v380_v15, %v380_v15  ;;  %v3667_v23 = vor.u32 %v4540_v12, %v3666_v7  ;;  %v3076_v9 = vld [vmem:[#allocation5 + $0xf0] sm:$0xf0]  ;;  %v385_v15 = vunpack.c.l.b16 %v108_v3 }
  0x44   :  { %v3922_v16 = vld [vmem:[#allocation5 + $0x780] sm:$0xf]  ;;  %v3795_v24 = vor.u32 %v4572_v14, %v3794_v13  ;;  %v4504_v26 = vld [vmem:[#allocation5 + $0x46c] sm:$0xf0]  ;;  %1738 = vmatpush.bf16.msrb.mxu0 %v3539_v21  ;;  %v3204_v12 = vld [vmem:[#allocation5 + $0x1f0] sm:$0xf0] }
  0x45   :  { %v3522_v25 = vld [vmem:[#allocation5 + $0x460] sm:$0xf]  ;;  %v3923_v28 = vor.u32 %v4604_v17, %v3922_v16  ;;  %v4536_v29 = vld [vmem:[#allocation5 + $0x56c] sm:$0xf0]  ;;  %1691 = vmatmul.bf16.vlgmr.msra.gmra.mxu0 %v4947_v19  ;;  %1704 = vmatmul.bf16.vlgmr.msra.gmra.mxu1 %v4951_v22  ;;  %v4454_v13 = vld [vmem:[#allocation5 + $0x2e4] sm:$0xf] }
  0x46   :  { %v3650_v27 = vld [vmem:[#allocation5 + $0x560] sm:$0xf]  ;;  %v4568_v31 = vld [vmem:[#allocation5 + $0x66c] sm:$0xf0]  ;;  %v3523_v34 = vor.u32 %v4504_v26, %v3522_v25  ;;  %1751 = vmatpush.bf16.msrb.mxu1 %v3667_v23  ;;  %1764 = vmatpush.bf16.msrb.mxu2 %v3795_v24  ;;  %v3332_v14 = vld [vmem:[#allocation5 + $0x2f0] sm:$0xf0]  ;;  %v386_v25 = vunpack.c.h.b16 %v108_v3 }
  0x47   :  { %v3778_v30 = vld [vmem:[#allocation5 + $0x660] sm:$0xf]  ;;  %v4600_v33 = vld [vmem:[#allocation5 + $0x76c] sm:$0xf0]  ;;  %v3651_v35 = vor.u32 %v4536_v29, %v3650_v27  ;;  %1777 = vmatpush.bf16.msrb.mxu3 %v3923_v28  ;;  %v4486_v21 = vld [vmem:[#allocation5 + $0x3e4] sm:$0xf]  ;;  %v3079_v27 = vor.u32 %v4390_v8, %v3076_v9  ;;  %v3207_v29 = vor.u32 %v4422_v10, %v3204_v12 }
  0x48   :  { %v3906_v32 = vld [vmem:[#allocation5 + $0x760] sm:$0xf]  ;;  %v3779_v36 = vor.u32 %v4568_v31, %v3778_v30  ;;  %v4500_v38 = vld [vmem:[#allocation5 + $0x44c] sm:$0xf0]  ;;  %1739 = vmatpush.bf16.msrb.mxu0 %v3523_v34  ;;  %v3460_v23 = vld [vmem:[#allocation5 + $0x3f0] sm:$0xf0]  ;;  %v3335_v30 = vor.u32 %v4454_v13, %v3332_v14 }
  0x49   :  { %v3506_v37 = vld [vmem:[#allocation5 + $0x440] sm:$0xf]  ;;  %v3907_v40 = vor.u32 %v4600_v33, %v3906_v32  ;;  %v4532_v41 = vld [vmem:[#allocation5 + $0x54c] sm:$0xf0]  ;;  %v4386_v31 = vld [vmem:[#allocation5 + $0xc4] sm:$0xf]  ;;  %v3463_v34 = vor.u32 %v4486_v21, %v3460_v23 }
  0x4a   :  { %v3634_v39 = vld [vmem:[#allocation5 + $0x540] sm:$0xf]  ;;  %v4564_v43 = vld [vmem:[#allocation5 + $0x64c] sm:$0xf0]  ;;  %v3507_v46 = vor.u32 %v4500_v38, %v3506_v37  ;;  %1752 = vmatpush.bf16.msrb.mxu1 %v3651_v35  ;;  %1765 = vmatpush.bf16.msrb.mxu2 %v3779_v36  ;;  %v3060_v32 = vld [vmem:[#allocation5 + $0xd0] sm:$0xf0]  ;;  %v4957_v38 = vpack.c.b16 %v385_v15, %v385_v15 }
  0x4b   :  { %v3762_v42 = vld [vmem:[#allocation5 + $0x640] sm:$0xf]  ;;  %v4596_v45 = vld [vmem:[#allocation5 + $0x74c] sm:$0xf0]  ;;  %v3635_v47 = vor.u32 %v4532_v41, %v3634_v39  ;;  %1778 = vmatpush.bf16.msrb.mxu3 %v3907_v40  ;;  %v4418_v33 = vld [vmem:[#allocation5 + $0x1c4] sm:$0xf] }
  0x4c   :  { %v3890_v44 = vld [vmem:[#allocation5 + $0x740] sm:$0xf]  ;;  %v3763_v48 = vor.u32 %v4564_v43, %v3762_v42  ;;  %v4496_v50 = vld [vmem:[#allocation5 + $0x42c] sm:$0xf0]  ;;  %1740 = vmatpush.bf16.msrb.mxu0 %v3507_v46  ;;  %v3188_v35 = vld [vmem:[#allocation5 + $0x1d0] sm:$0xf0]  ;;  %v4961_v42 = vpack.c.b16 %v386_v25, %v386_v25  ;;  %v3063_v43 = vor.u32 %v4386_v31, %v3060_v32 }
  0x4d   :  { %v3490_v49 = vld [vmem:[#allocation5 + $0x420] sm:$0xf]  ;;  %v3891_v52 = vor.u32 %v4596_v45, %v3890_v44  ;;  %v4528_v53 = vld [vmem:[#allocation5 + $0x52c] sm:$0xf0]  ;;  %v4450_v36 = vld [vmem:[#allocation5 + $0x2c4] sm:$0xf]  ;;  %v3191_v45 = vor.u32 %v4418_v33, %v3188_v35 }
  0x4e   :  { %v3618_v51 = vld [vmem:[#allocation5 + $0x520] sm:$0xf]  ;;  %v4560_v55 = vld [vmem:[#allocation5 + $0x62c] sm:$0xf0]  ;;  %v3491_v59 = vor.u32 %v4496_v50, %v3490_v49  ;;  %1753 = vmatpush.bf16.msrb.mxu1 %v3635_v47  ;;  %1766 = vmatpush.bf16.msrb.mxu2 %v3763_v48  ;;  %v3316_v37 = vld [vmem:[#allocation5 + $0x2d0] sm:$0xf0] }
  0x4f   :  { %v3746_v54 = vld [vmem:[#allocation5 + $0x620] sm:$0xf]  ;;  %v4592_v57 = vld [vmem:[#allocation5 + $0x72c] sm:$0xf0]  ;;  %v3619_v63 = vor.u32 %v4528_v53, %v3618_v51  ;;  %1779 = vmatpush.bf16.msrb.mxu3 %v3891_v52  ;;  %v4482_v39 = vld [vmem:[#allocation5 + $0x3c4] sm:$0xf]  ;;  %v3319_v46 = vor.u32 %v4450_v36, %v3316_v37 }
  0x50   :  { %v3874_v56 = vld [vmem:[#allocation5 + $0x720] sm:$0xf]  ;;  %v4492_v60 = vld [vmem:[#allocation5 + $0x40c] sm:$0xf0]  ;;  %v3747_v0 = vor.u32 %v4560_v55, %v3746_v54  ;;  %1741 = vmatpush.bf16.msrb.mxu0 %v3491_v59  ;;  %v3444_v40 = vld [vmem:[#allocation5 + $0x3d0] sm:$0xf0] }
  0x51   :  { %v3474_v58 = vld [vmem:[#allocation5 + $0x400] sm:$0xf]  ;;  %v4524_v62 = vld [vmem:[#allocation5 + $0x50c] sm:$0xf0]  ;;  %v3875_v4 = vor.u32 %v4592_v57, %v3874_v56  ;;  %v4382_v47 = vld [vmem:[#allocation5 + $0xa4] sm:$0xf]  ;;  %v3447_v50 = vor.u32 %v4482_v39, %v3444_v40 }
  0x52   :  { %v3602_v61 = vld [vmem:[#allocation5 + $0x500] sm:$0xf]  ;;  %v4556_v2 = vld [vmem:[#allocation5 + $0x60c] sm:$0xf0]  ;;  %v3475_v11 = vor.u32 %v4492_v60, %v3474_v58  ;;  %1754 = vmatpush.bf16.msrb.mxu1 %v3619_v63  ;;  %1767 = vmatpush.bf16.msrb.mxu2 %v3747_v0  ;;  %v3044_v48 = vld [vmem:[#allocation5 + $0xb0] sm:$0xf0] }
  0x53   :  { %v3730_v1 = vld [vmem:[#allocation5 + $0x600] sm:$0xf]  ;;  %v4588_v6 = vld [vmem:[#allocation5 + $0x70c] sm:$0xf0]  ;;  %v3603_v16 = vor.u32 %v4524_v62, %v3602_v61  ;;  %1780 = vmatpush.bf16.msrb.mxu3 %v3875_v4  ;;  %v4414_v49 = vld [vmem:[#allocation5 + $0x1a4] sm:$0xf]  ;;  %v3047_v56 = vor.u32 %v4382_v47, %v3044_v48 }
  0x54   :  { %v3858_v5 = vld [vmem:[#allocation5 + $0x700] sm:$0xf]  ;;  %v107_v7 = vld [vmem:[#allocation2 + $0x10] sm:$0xff]  ;;  %v3731_v17 = vor.u32 %v4556_v2, %v3730_v1  ;;  %1742 = vmatpush.bf16.msrb.mxu0 %v3475_v11  ;;  %v4446_v52 = vld [vmem:[#allocation5 + $0x2a4] sm:$0xf] }
  0x55   :  { %v383_v24 = vunpack.c.l.b16 %v107_v7  ;;  %v3859_v26 = vor.u32 %v4588_v6, %v3858_v5  ;;  %v384_v28 = vunpack.c.h.b16 %v107_v7  ;;  %v3172_v51 = vld [vmem:[#allocation5 + $0x1b0] sm:$0xf0]  ;;  %v4478_v54 = vld [vmem:[#allocation5 + $0x3a4] sm:$0xf] }
  0x56   :  { %1755 = vmatpush.bf16.msrb.mxu1 %v3603_v16  ;;  %1768 = vmatpush.bf16.msrb.mxu2 %v3731_v17  ;;  %v3300_v53 = vld [vmem:[#allocation5 + $0x2b0] sm:$0xf0]  ;;  %v3175_v57 = vor.u32 %v4414_v49, %v3172_v51  ;;  %v4378_v59 = vld [vmem:[#allocation5 + $0x84] sm:$0xf] }
  0x57   :  { %v4959_v41 = vpack.c.b16 %v383_v24, %v383_v24  ;;  %1781 = vmatpush.bf16.msrb.mxu3 %v3859_v26  ;;  %v4963_v44 = vpack.c.b16 %v384_v28, %v384_v28  ;;  %v3428_v55 = vld [vmem:[#allocation5 + $0x3b0] sm:$0xf0]  ;;  %v3303_v58 = vor.u32 %v4446_v52, %v3300_v53  ;;  %v4410_v61 = vld [vmem:[#allocation5 + $0x184] sm:$0xf] }
  0x58   :  { %1787 = vmatpush.bf16.msra.mxu0 %v3079_v27  ;;  %v3028_v60 = vld [vmem:[#allocation5 + $0x90] sm:$0xf0]  ;;  %v3431_v62 = vor.u32 %v4478_v54, %v3428_v55  ;;  %v4442_v0 = vld [vmem:[#allocation5 + $0x284] sm:$0xf] }
  0x59   :  { %1769 = vmatmul.bf16.vlgmr.msrb.gmra.mxu2 %v4957_v38  ;;  %1743 = vmatmul.bf16.vlgmr.msrb.gmra.mxu0 %v4959_v41  ;;  %v3156_v63 = vld [vmem:[#allocation5 + $0x190] sm:$0xf0]  ;;  %v4474_v2 = vld [vmem:[#allocation5 + $0x384] sm:$0xf]  ;;  %v3031_v4 = vor.u32 %v4378_v59, %v3028_v60 }
  0x5a   :  { %1800 = vmatpush.bf16.msra.mxu1 %v3207_v29  ;;  %1813 = vmatpush.bf16.msra.mxu2 %v3335_v30  ;;  %v3284_v1 = vld [vmem:[#allocation5 + $0x290] sm:$0xf0]  ;;  %v3159_v5 = vor.u32 %v4410_v61, %v3156_v63  ;;  %v4374_v7 = vld [vmem:[#allocation5 + $0x64] sm:$0xf] }
  0x5b   :  { %1826 = vmatpush.bf16.msra.mxu3 %v3463_v34  ;;  %1756 = vmatmul.bf16.vlgmr.msrb.gmra.mxu1 %v4963_v44  ;;  %v3412_v3 = vld [vmem:[#allocation5 + $0x390] sm:$0xf0]  ;;  %v3287_v6 = vor.u32 %v4442_v0, %v3284_v1  ;;  %v4406_v9 = vld [vmem:[#allocation5 + $0x164] sm:$0xf] }
  0x5c   :  { %1782 = vmatmul.bf16.vlgmr.msrb.gmra.mxu3 %v4961_v42  ;;  %1788 = vmatpush.bf16.msra.mxu0 %v3063_v43  ;;  %v3012_v8 = vld [vmem:[#allocation5 + $0x70] sm:$0xf0]  ;;  %v3415_v10 = vor.u32 %v4474_v2, %v3412_v3  ;;  %v4438_v12 = vld [vmem:[#allocation5 + $0x264] sm:$0xf] }
  0x5d   :  { %v3140_v11 = vld [vmem:[#allocation5 + $0x170] sm:$0xf0]  ;;  %v4470_v14 = vld [vmem:[#allocation5 + $0x364] sm:$0xf]  ;;  %v3015_v16 = vor.u32 %v4374_v7, %v3012_v8 }
  0x5e   :  { %1801 = vmatpush.bf16.msra.mxu1 %v3191_v45  ;;  %1814 = vmatpush.bf16.msra.mxu2 %v3319_v46  ;;  %v3268_v13 = vld [vmem:[#allocation5 + $0x270] sm:$0xf0]  ;;  %v3143_v17 = vor.u32 %v4406_v9, %v3140_v11  ;;  %v4370_v23 = vld [vmem:[#allocation5 + $0x44] sm:$0xf] }
  0x5f   :  { %1827 = vmatpush.bf16.msra.mxu3 %v3447_v50  ;;  %v3396_v15 = vld [vmem:[#allocation5 + $0x370] sm:$0xf0]  ;;  %v3271_v21 = vor.u32 %v4438_v12, %v3268_v13  ;;  %v4402_v25 = vld [vmem:[#allocation5 + $0x144] sm:$0xf] }
  0x60   :  { %1789 = vmatpush.bf16.msra.mxu0 %v3047_v56  ;;  %v2996_v24 = vld [vmem:[#allocation5 + $0x50] sm:$0xf0]  ;;  %v3399_v26 = vor.u32 %v4470_v14, %v3396_v15  ;;  %v4434_v28 = vld [vmem:[#allocation5 + $0x244] sm:$0xf] }
  0x61   :  { %v3124_v27 = vld [vmem:[#allocation5 + $0x150] sm:$0xf0]  ;;  %v4466_v30 = vld [vmem:[#allocation5 + $0x344] sm:$0xf]  ;;  %v2999_v32 = vor.u32 %v4370_v23, %v2996_v24 }
  0x62   :  { %1802 = vmatpush.bf16.msra.mxu1 %v3175_v57  ;;  %1815 = vmatpush.bf16.msra.mxu2 %v3303_v58  ;;  %v3252_v29 = vld [vmem:[#allocation5 + $0x250] sm:$0xf0]  ;;  %v4366_v33 = vld [vmem:[#allocation5 + $0x24] sm:$0xf]  ;;  %v3127_v34 = vor.u32 %v4402_v25, %v3124_v27 }
  0x63   :  { %1828 = vmatpush.bf16.msra.mxu3 %v3431_v62  ;;  %v3380_v31 = vld [vmem:[#allocation5 + $0x350] sm:$0xf0]  ;;  %v3255_v35 = vor.u32 %v4434_v28, %v3252_v29  ;;  %v4398_v37 = vld [vmem:[#allocation5 + $0x124] sm:$0xf] }
  0x64   :  { %1790 = vmatpush.bf16.msra.mxu0 %v3031_v4  ;;  %v2980_v36 = vld [vmem:[#allocation5 + $0x30] sm:$0xf0]  ;;  %v3383_v40 = vor.u32 %v4466_v30, %v3380_v31  ;;  %v4430_v43 = vld [vmem:[#allocation5 + $0x224] sm:$0xf] }
  0x65   :  { %v3108_v39 = vld [vmem:[#allocation5 + $0x130] sm:$0xf0]  ;;  %v4462_v46 = vld [vmem:[#allocation5 + $0x324] sm:$0xf]  ;;  %v2983_v48 = vor.u32 %v4366_v33, %v2980_v36 }
  0x66   :  { %1803 = vmatpush.bf16.msra.mxu1 %v3159_v5  ;;  %1816 = vmatpush.bf16.msra.mxu2 %v3287_v6  ;;  %v3236_v45 = vld [vmem:[#allocation5 + $0x230] sm:$0xf0]  ;;  %v4362_v49 = vld [vmem:[#allocation5 + $0x4] sm:$0xf]  ;;  %v3111_v51 = vor.u32 %v4398_v37, %v3108_v39 }
  0x67   :  { %1829 = vmatpush.bf16.msra.mxu3 %v3415_v10  ;;  %v3364_v47 = vld [vmem:[#allocation5 + $0x330] sm:$0xf0]  ;;  %v3239_v52 = vor.u32 %v4430_v43, %v3236_v45  ;;  %v4394_v53 = vld [vmem:[#allocation5 + $0x104] sm:$0xf] }
  0x68   :  { %1791 = vmatpush.bf16.msra.mxu0 %v3015_v16  ;;  %v2964_v50 = vld [vmem:[#allocation5 + $0x10] sm:$0xf0]  ;;  %v4426_v55 = vld [vmem:[#allocation5 + $0x204] sm:$0xf]  ;;  %v3367_v56 = vor.u32 %v4462_v46, %v3364_v47 }
  0x69   :  { %v3092_v54 = vld [vmem:[#allocation5 + $0x110] sm:$0xf0]  ;;  %v4458_v58 = vld [vmem:[#allocation5 + $0x304] sm:$0xf]  ;;  %v2967_v63 = vor.u32 %v4362_v49, %v2964_v50 }
  0x6a   :  { %1804 = vmatpush.bf16.msra.mxu1 %v3143_v17  ;;  %1817 = vmatpush.bf16.msra.mxu2 %v3271_v21  ;;  %v3220_v57 = vld [vmem:[#allocation5 + $0x210] sm:$0xf0]  ;;  %v4518_v60 = vld [vmem:[#allocation5 + $0x4e4] sm:$0xf]  ;;  %v3095_v3 = vor.u32 %v4394_v53, %v3092_v54 }
  0x6b   :  { %1830 = vmatpush.bf16.msra.mxu3 %v3399_v26  ;;  %v3348_v59 = vld [vmem:[#allocation5 + $0x310] sm:$0xf0]  ;;  %v4550_v62 = vld [vmem:[#allocation5 + $0x5e4] sm:$0xf]  ;;  %v3223_v4 = vor.u32 %v4426_v55, %v3220_v57 }
  0x6c   :  { %1792 = vmatpush.bf16.msra.mxu0 %v2999_v32  ;;  %v3588_v61 = vld [vmem:[#allocation5 + $0x4f0] sm:$0xf0]  ;;  %v4582_v1 = vld [vmem:[#allocation5 + $0x6e4] sm:$0xf]  ;;  %v3351_v7 = vor.u32 %v4458_v58, %v3348_v59 }
  0x6d   :  { %v3716_v0 = vld [vmem:[#allocation5 + $0x5f0] sm:$0xf0]  ;;  %v4614_v5 = vld [vmem:[#allocation5 + $0x7e4] sm:$0xf]  ;;  %v3591_v8 = vor.u32 %v4518_v60, %v3588_v61 }
  0x6e   :  { %1805 = vmatpush.bf16.msra.mxu1 %v3127_v34  ;;  %1818 = vmatpush.bf16.msra.mxu2 %v3255_v35  ;;  %v3844_v2 = vld [vmem:[#allocation5 + $0x6f0] sm:$0xf0]  ;;  %v3719_v9 = vor.u32 %v4550_v62, %v3716_v0  ;;  %v4514_v11 = vld [vmem:[#allocation5 + $0x4c4] sm:$0xf] }
  0x6f   :  { %1831 = vmatpush.bf16.msra.mxu3 %v3383_v40  ;;  %v3972_v6 = vld [vmem:[#allocation5 + $0x7f0] sm:$0xf0]  ;;  %v3847_v10 = vor.u32 %v4582_v1, %v3844_v2  ;;  %v4546_v13 = vld [vmem:[#allocation5 + $0x5c4] sm:$0xf] }
  0x70   :  { %1793 = vmatpush.bf16.msra.mxu0 %v2983_v48  ;;  %v3572_v12 = vld [vmem:[#allocation5 + $0x4d0] sm:$0xf0]  ;;  %v3975_v14 = vor.u32 %v4614_v5, %v3972_v6  ;;  %v4578_v16 = vld [vmem:[#allocation5 + $0x6c4] sm:$0xf] }
  0x71   :  { %v3700_v15 = vld [vmem:[#allocation5 + $0x5d0] sm:$0xf0]  ;;  %v4610_v21 = vld [vmem:[#allocation5 + $0x7c4] sm:$0xf]  ;;  %v3575_v24 = vor.u32 %v4514_v11, %v3572_v12 }
  0x72   :  { %1806 = vmatpush.bf16.msra.mxu1 %v3111_v51  ;;  %1819 = vmatpush.bf16.msra.mxu2 %v3239_v52  ;;  %v3828_v17 = vld [vmem:[#allocation5 + $0x6d0] sm:$0xf0]  ;;  %v3703_v25 = vor.u32 %v4546_v13, %v3700_v15  ;;  %v4510_v27 = vld [vmem:[#allocation5 + $0x4a4] sm:$0xf] }
  0x73   :  { %1832 = vmatpush.bf16.msra.mxu3 %v3367_v56  ;;  %v3956_v23 = vld [vmem:[#allocation5 + $0x7d0] sm:$0xf0]  ;;  %v3831_v26 = vor.u32 %v4578_v16, %v3828_v17  ;;  %v4542_v29 = vld [vmem:[#allocation5 + $0x5a4] sm:$0xf] }
  0x74   :  { %1794 = vmatpush.bf16.msra.mxu0 %v2967_v63  ;;  %v3556_v28 = vld [vmem:[#allocation5 + $0x4b0] sm:$0xf0]  ;;  %v3959_v30 = vor.u32 %v4610_v21, %v3956_v23  ;;  %v4574_v32 = vld [vmem:[#allocation5 + $0x6a4] sm:$0xf] }
  0x75   :  { %v3684_v31 = vld [vmem:[#allocation5 + $0x5b0] sm:$0xf0]  ;;  %v4606_v34 = vld [vmem:[#allocation5 + $0x7a4] sm:$0xf]  ;;  %v3559_v36 = vor.u32 %v4510_v27, %v3556_v28 }
  0x76   :  { %1807 = vmatpush.bf16.msra.mxu1 %v3095_v3  ;;  %1820 = vmatpush.bf16.msra.mxu2 %v3223_v4  ;;  %v3812_v33 = vld [vmem:[#allocation5 + $0x6b0] sm:$0xf0]  ;;  %v3687_v37 = vor.u32 %v4542_v29, %v3684_v31  ;;  %v4506_v40 = vld [vmem:[#allocation5 + $0x484] sm:$0xf] }
  0x77   :  { %1833 = vmatpush.bf16.msra.mxu3 %v3351_v7  ;;  %v3940_v35 = vld [vmem:[#allocation5 + $0x7b0] sm:$0xf0]  ;;  %1795 = vmatmul.bf16.vlgmr.msra.gmra.mxu0 %v4947_v19  ;;  %v3815_v39 = vor.u32 %v4574_v32, %v3812_v33  ;;  %v4538_v45 = vld [vmem:[#allocation5 + $0x584] sm:$0xf] }
  0x78   :  { %1839 = vmatpush.bf16.msrb.mxu0 %v3591_v8  ;;  %v3540_v43 = vld [vmem:[#allocation5 + $0x490] sm:$0xf0]  ;;  %v3943_v46 = vor.u32 %v4606_v34, %v3940_v35  ;;  %v4570_v48 = vld [vmem:[#allocation5 + $0x684] sm:$0xf] }
  0x79   :  { %1821 = vmatmul.bf16.vlgmr.msra.gmra.mxu2 %v4945_v18  ;;  %1808 = vmatmul.bf16.vlgmr.msra.gmra.mxu1 %v4951_v22  ;;  %v3668_v47 = vld [vmem:[#allocation5 + $0x590] sm:$0xf0]  ;;  %v4602_v50 = vld [vmem:[#allocation5 + $0x784] sm:$0xf]  ;;  %v3543_v52 = vor.u32 %v4506_v40, %v3540_v43  ;;  %v3082_v43 = vld [vmem:[#allocation5 + $0xe8] sm:$0xf] }
  0x7a   :  { %1852 = vmatpush.bf16.msrb.mxu1 %v3719_v9  ;;  %1865 = vmatpush.bf16.msrb.mxu2 %v3847_v10  ;;  %v3796_v49 = vld [vmem:[#allocation5 + $0x690] sm:$0xf0]  ;;  %v3671_v53 = vor.u32 %v4538_v45, %v3668_v47  ;;  %v4502_v55 = vld [vmem:[#allocation5 + $0x464] sm:$0xf]  ;;  %v4393_v45 = vld [vmem:[#allocation5 + $0xf4] sm:$0xf0] }
  0x7b   :  { %1878 = vmatpush.bf16.msrb.mxu3 %v3975_v14  ;;  %v3924_v51 = vld [vmem:[#allocation5 + $0x790] sm:$0xf0]  ;;  %v3799_v54 = vor.u32 %v4570_v48, %v3796_v49  ;;  %v4534_v57 = vld [vmem:[#allocation5 + $0x564] sm:$0xf]  ;;  %v4425_v48 = vld [vmem:[#allocation5 + $0x1f4] sm:$0xf0] }
  0x7c   :  { %1834 = vmatmul.bf16.vlgmr.msra.gmra.mxu3 %v4949_v20  ;;  %1840 = vmatpush.bf16.msrb.mxu0 %v3575_v24  ;;  %v3524_v56 = vld [vmem:[#allocation5 + $0x470] sm:$0xf0]  ;;  %v3927_v58 = vor.u32 %v4602_v50, %v3924_v51  ;;  %v4566_v60 = vld [vmem:[#allocation5 + $0x664] sm:$0xf]  ;;  %v3338_v49 = vld [vmem:[#allocation5 + $0x2e8] sm:$0xf] }
  0x7d   :  { %v3652_v59 = vld [vmem:[#allocation5 + $0x570] sm:$0xf0]  ;;  %v4598_v62 = vld [vmem:[#allocation5 + $0x764] sm:$0xf]  ;;  %v3527_v0 = vor.u32 %v4502_v55, %v3524_v56  ;;  %v4457_v50 = vld [vmem:[#allocation5 + $0x2f4] sm:$0xf0]  ;;  %v3083_v56 = vor.u32 %v4393_v45, %v3082_v43 }
  0x7e   :  { %1853 = vmatpush.bf16.msrb.mxu1 %v3703_v25  ;;  %1866 = vmatpush.bf16.msrb.mxu2 %v3831_v26  ;;  %v3780_v61 = vld [vmem:[#allocation5 + $0x670] sm:$0xf0]  ;;  %v3655_v1 = vor.u32 %v4534_v57, %v3652_v59  ;;  %v4498_v3 = vld [vmem:[#allocation5 + $0x444] sm:$0xf]  ;;  %v3066_v59 = vld [vmem:[#allocation5 + $0xc8] sm:$0xf] }
  0x7f   :  { %1879 = vmatpush.bf16.msrb.mxu3 %v3959_v30  ;;  %v3908_v63 = vld [vmem:[#allocation5 + $0x770] sm:$0xf0]  ;;  %v3783_v2 = vor.u32 %v4566_v60, %v3780_v61  ;;  %v4530_v5 = vld [vmem:[#allocation5 + $0x544] sm:$0xf]  ;;  %v4389_v60 = vld [vmem:[#allocation5 + $0xd4] sm:$0xf0] }
  0x80   :  { %1841 = vmatpush.bf16.msrb.mxu0 %v3559_v36  ;;  %v3508_v4 = vld [vmem:[#allocation5 + $0x450] sm:$0xf0]  ;;  %v3911_v6 = vor.u32 %v4598_v62, %v3908_v63  ;;  %v4562_v8 = vld [vmem:[#allocation5 + $0x644] sm:$0xf]  ;;  %v3194_v61 = vld [vmem:[#allocation5 + $0x1c8] sm:$0xf] }
  0x81   :  { %v3636_v7 = vld [vmem:[#allocation5 + $0x550] sm:$0xf0]  ;;  %v4594_v10 = vld [vmem:[#allocation5 + $0x744] sm:$0xf]  ;;  %v3511_v12 = vor.u32 %v4498_v3, %v3508_v4  ;;  %v4421_v63 = vld [vmem:[#allocation5 + $0x1d4] sm:$0xf0]  ;;  %v3067_v4 = vor.u32 %v4389_v60, %v3066_v59 }
  0x82   :  { %1854 = vmatpush.bf16.msrb.mxu1 %v3687_v37  ;;  %1867 = vmatpush.bf16.msrb.mxu2 %v3815_v39  ;;  %v3764_v9 = vld [vmem:[#allocation5 + $0x650] sm:$0xf0]  ;;  %v3639_v13 = vor.u32 %v4530_v5, %v3636_v7  ;;  %v4494_v15 = vld [vmem:[#allocation5 + $0x424] sm:$0xf]  ;;  %v4485_v3 = vld [vmem:[#allocation5 + $0x3d4] sm:$0xf0]  ;;  %v3195_v5 = vor.u32 %v4421_v63, %v3194_v61 }
  0x83   :  { %1880 = vmatpush.bf16.msrb.mxu3 %v3943_v46  ;;  %v3892_v11 = vld [vmem:[#allocation5 + $0x750] sm:$0xf0]  ;;  %v3767_v14 = vor.u32 %v4562_v8, %v3764_v9  ;;  %v4526_v17 = vld [vmem:[#allocation5 + $0x524] sm:$0xf]  ;;  %v3210_v46 = vld [vmem:[#allocation5 + $0x1e8] sm:$0xf] }
  0x84   :  { %1842 = vmatpush.bf16.msrb.mxu0 %v3543_v52  ;;  %v3492_v16 = vld [vmem:[#allocation5 + $0x430] sm:$0xf0]  ;;  %v3895_v21 = vor.u32 %v4594_v10, %v3892_v11  ;;  %v4558_v24 = vld [vmem:[#allocation5 + $0x624] sm:$0xf]  ;;  %v3211_v57 = vor.u32 %v4425_v48, %v3210_v46  ;;  %v3050_v7 = vld [vmem:[#allocation5 + $0xa8] sm:$0xf] }
  0x85   :  { %v3620_v23 = vld [vmem:[#allocation5 + $0x530] sm:$0xf0]  ;;  %v4590_v26 = vld [vmem:[#allocation5 + $0x724] sm:$0xf]  ;;  %v3495_v28 = vor.u32 %v4494_v15, %v3492_v16  ;;  %v4385_v8 = vld [vmem:[#allocation5 + $0xb4] sm:$0xf0] }
  0x86   :  { %1855 = vmatpush.bf16.msrb.mxu1 %v3671_v53  ;;  %1868 = vmatpush.bf16.msrb.mxu2 %v3799_v54  ;;  %v3748_v25 = vld [vmem:[#allocation5 + $0x630] sm:$0xf0]  ;;  %v4490_v29 = vld [vmem:[#allocation5 + $0x404] sm:$0xf]  ;;  %v3623_v31 = vor.u32 %v4526_v17, %v3620_v23  ;;  %v3466_v53 = vld [vmem:[#allocation5 + $0x3e8] sm:$0xf]  ;;  %v3051_v16 = vor.u32 %v4385_v8, %v3050_v7 }
  0x87   :  { %1881 = vmatpush.bf16.msrb.mxu3 %v3927_v58  ;;  %v3876_v27 = vld [vmem:[#allocation5 + $0x730] sm:$0xf0]  ;;  %v3751_v32 = vor.u32 %v4558_v24, %v3748_v25  ;;  %v4522_v33 = vld [vmem:[#allocation5 + $0x504] sm:$0xf]  ;;  %v4489_v54 = vld [vmem:[#allocation5 + $0x3f4] sm:$0xf0]  ;;  %v3339_v58 = vor.u32 %v4457_v50, %v3338_v49 }
  0x88   :  { %1843 = vmatpush.bf16.msrb.mxu0 %v3527_v0  ;;  %v3476_v30 = vld [vmem:[#allocation5 + $0x410] sm:$0xf0]  ;;  %v4554_v35 = vld [vmem:[#allocation5 + $0x604] sm:$0xf]  ;;  %v3879_v36 = vor.u32 %v4590_v26, %v3876_v27  ;;  %v3467_v62 = vor.u32 %v4489_v54, %v3466_v53  ;;  %v3322_v0 = vld [vmem:[#allocation5 + $0x2c8] sm:$0xf] }
  0x89   :  { %v3604_v34 = vld [vmem:[#allocation5 + $0x510] sm:$0xf0]  ;;  %v4586_v39 = vld [vmem:[#allocation5 + $0x704] sm:$0xf]  ;;  %v3479_v47 = vor.u32 %v4490_v29, %v3476_v30  ;;  %v3178_v9 = vld [vmem:[#allocation5 + $0x1a8] sm:$0xf] }
  0x8a   :  { %1856 = vmatpush.bf16.msrb.mxu1 %v3655_v1  ;;  %1869 = vmatpush.bf16.msrb.mxu2 %v3783_v2  ;;  %v3732_v37 = vld [vmem:[#allocation5 + $0x610] sm:$0xf0]  ;;  %v3607_v51 = vor.u32 %v4522_v33, %v3604_v34  ;;  %v4453_v1 = vld [vmem:[#allocation5 + $0x2d4] sm:$0xf0]  ;;  %v3450_v2 = vld [vmem:[#allocation5 + $0x3c8] sm:$0xf] }
  0x8b   :  { %1882 = vmatpush.bf16.msrb.mxu3 %v3911_v6  ;;  %v3860_v40 = vld [vmem:[#allocation5 + $0x710] sm:$0xf0]  ;;  %v3735_v52 = vor.u32 %v4554_v35, %v3732_v37  ;;  %v3323_v6 = vor.u32 %v4453_v1, %v3322_v0  ;;  %v3451_v10 = vor.u32 %v4485_v3, %v3450_v2  ;;  %v4417_v11 = vld [vmem:[#allocation5 + $0x1b4] sm:$0xf0]  ;;  %v3034_v23 = vld [vmem:[#allocation5 + $0x88] sm:$0xf] }
  0x8c   :  { %1844 = vmatpush.bf16.msrb.mxu0 %v3511_v12  ;;  %v3863_v55 = vor.u32 %v4586_v39, %v3860_v40  ;;  %v3306_v12 = vld [vmem:[#allocation5 + $0x2a8] sm:$0xf]  ;;  %v4481_v15 = vld [vmem:[#allocation5 + $0x3b4] sm:$0xf0]  ;;  %v3179_v17 = vor.u32 %v4417_v11, %v3178_v9 }
  0x8d   :  { %v4381_v24 = vld [vmem:[#allocation5 + $0x94] sm:$0xf0]  ;;  %v3162_v25 = vld [vmem:[#allocation5 + $0x188] sm:$0xf] }
  0x8e   :  { %1857 = vmatpush.bf16.msrb.mxu1 %v3639_v13  ;;  %1870 = vmatpush.bf16.msrb.mxu2 %v3767_v14  ;;  %v4449_v13 = vld [vmem:[#allocation5 + $0x2b4] sm:$0xf0]  ;;  %v3434_v14 = vld [vmem:[#allocation5 + $0x3a8] sm:$0xf] }
  0x8f   :  { %1883 = vmatpush.bf16.msrb.mxu3 %v3895_v21  ;;  %v3307_v21 = vor.u32 %v4449_v13, %v3306_v12  ;;  %v3435_v26 = vor.u32 %v4481_v15, %v3434_v14  ;;  %v4413_v27 = vld [vmem:[#allocation5 + $0x194] sm:$0xf0]  ;;  %v3418_v30 = vld [vmem:[#allocation5 + $0x388] sm:$0xf] }
  0x90   :  { %1845 = vmatpush.bf16.msrb.mxu0 %v3495_v28  ;;  %v3290_v28 = vld [vmem:[#allocation5 + $0x288] sm:$0xf]  ;;  %v4445_v29 = vld [vmem:[#allocation5 + $0x294] sm:$0xf0]  ;;  %v3163_v33 = vor.u32 %v4413_v27, %v3162_v25 }
  0x91   :  { %v3291_v34 = vor.u32 %v4445_v29, %v3290_v28  ;;  %v3018_v35 = vld [vmem:[#allocation5 + $0x68] sm:$0xf]  ;;  %v4409_v40 = vld [vmem:[#allocation5 + $0x174] sm:$0xf0] }
  0x92   :  { %1858 = vmatpush.bf16.msrb.mxu1 %v3623_v31  ;;  %1871 = vmatpush.bf16.msrb.mxu2 %v3751_v32  ;;  %v4477_v31 = vld [vmem:[#allocation5 + $0x394] sm:$0xf0]  ;;  %v3035_v32 = vor.u32 %v4381_v24, %v3034_v23  ;;  %v3146_v37 = vld [vmem:[#allocation5 + $0x168] sm:$0xf] }
  0x93   :  { %1884 = vmatpush.bf16.msrb.mxu3 %v3879_v36  ;;  %v4377_v36 = vld [vmem:[#allocation5 + $0x74] sm:$0xf0]  ;;  %v3419_v39 = vor.u32 %v4477_v31, %v3418_v30  ;;  %v3274_v43 = vld [vmem:[#allocation5 + $0x268] sm:$0xf]  ;;  %v3147_v49 = vor.u32 %v4409_v40, %v3146_v37 }
  0x94   :  { %1846 = vmatpush.bf16.msrb.mxu0 %v3479_v47  ;;  %v4441_v45 = vld [vmem:[#allocation5 + $0x274] sm:$0xf0]  ;;  %v3402_v46 = vld [vmem:[#allocation5 + $0x368] sm:$0xf]  ;;  %v3019_v48 = vor.u32 %v4377_v36, %v3018_v35 }
  0x95   :  { %v4473_v47 = vld [vmem:[#allocation5 + $0x374] sm:$0xf0]  ;;  %v3275_v50 = vor.u32 %v4441_v45, %v3274_v43  ;;  %v3130_v53 = vld [vmem:[#allocation5 + $0x148] sm:$0xf] }
  0x96   :  { %1859 = vmatpush.bf16.msrb.mxu1 %v3607_v51  ;;  %1872 = vmatpush.bf16.msrb.mxu2 %v3735_v52  ;;  %v3002_v51 = vld [vmem:[#allocation5 + $0x48] sm:$0xf]  ;;  %v4373_v52 = vld [vmem:[#allocation5 + $0x54] sm:$0xf0]  ;;  %v3403_v54 = vor.u32 %v4473_v47, %v3402_v46 }
  0x97   :  { %1885 = vmatpush.bf16.msrb.mxu3 %v3863_v55  ;;  %1847 = vmatmul.bf16.vlgmr.msrb.gmra.mxu0 %v4959_v41  ;;  %v4405_v55 = vld [vmem:[#allocation5 + $0x154] sm:$0xf0]  ;;  %v3003_v60 = vor.u32 %v4373_v52, %v3002_v51  ;;  %v2986_v63 = vld [vmem:[#allocation5 + $0x28] sm:$0xf] }
  0x98   :  { %1891 = vmatpush.bf16.msra.mxu0 %v3083_v56  ;;  %v3258_v56 = vld [vmem:[#allocation5 + $0x248] sm:$0xf]  ;;  %v4469_v59 = vld [vmem:[#allocation5 + $0x354] sm:$0xf0]  ;;  %v3131_v61 = vor.u32 %v4405_v55, %v3130_v53 }
  0x99   :  { %1873 = vmatmul.bf16.vlgmr.msrb.gmra.mxu2 %v4957_v38  ;;  %1860 = vmatmul.bf16.vlgmr.msrb.gmra.mxu1 %v4963_v44  ;;  %v4369_v0 = vld [vmem:[#allocation5 + $0x34] sm:$0xf0]  ;;  %v3114_v1 = vld [vmem:[#allocation5 + $0x128] sm:$0xf] }
  0x9a   :  { %1904 = vmatpush.bf16.msra.mxu1 %v3211_v57  ;;  %1917 = vmatpush.bf16.msra.mxu2 %v3339_v58  ;;  %v4437_v57 = vld [vmem:[#allocation5 + $0x254] sm:$0xf0]  ;;  %v3386_v58 = vld [vmem:[#allocation5 + $0x348] sm:$0xf]  ;;  %v2987_v8 = vor.u32 %v4369_v0, %v2986_v63 }
  0x9b   :  { %1930 = vmatpush.bf16.msra.mxu3 %v3467_v62  ;;  %v3259_v62 = vor.u32 %v4437_v57, %v3258_v56  ;;  %v3387_v2 = vor.u32 %v4469_v59, %v3386_v58  ;;  %v4401_v3 = vld [vmem:[#allocation5 + $0x134] sm:$0xf0]  ;;  %v2970_v9 = vld [vmem:[#allocation5 + $0x8] sm:$0xf] }
  0x9c   :  { %1886 = vmatmul.bf16.vlgmr.msrb.gmra.mxu3 %v4961_v42  ;;  %1892 = vmatpush.bf16.msra.mxu0 %v3067_v4  ;;  %v3242_v4 = vld [vmem:[#allocation5 + $0x228] sm:$0xf]  ;;  %v4465_v7 = vld [vmem:[#allocation5 + $0x334] sm:$0xf0]  ;;  %v3115_v11 = vor.u32 %v4401_v3, %v3114_v1 }
  0x9d   :  { %v3098_v13 = vld [vmem:[#allocation5 + $0x108] sm:$0xf]  ;;  %v4397_v14 = vld [vmem:[#allocation5 + $0x114] sm:$0xf0] }
  0x9e   :  { %1905 = vmatpush.bf16.msra.mxu1 %v3195_v5  ;;  %1918 = vmatpush.bf16.msra.mxu2 %v3323_v6  ;;  %v4433_v5 = vld [vmem:[#allocation5 + $0x234] sm:$0xf0]  ;;  %v3370_v6 = vld [vmem:[#allocation5 + $0x328] sm:$0xf]  ;;  %v3099_v31 = vor.u32 %v4397_v14, %v3098_v13 }
  0x9f   :  { %1931 = vmatpush.bf16.msra.mxu3 %v3451_v10  ;;  %v4365_v10 = vld [vmem:[#allocation5 + $0x14] sm:$0xf0]  ;;  %v3243_v12 = vor.u32 %v4433_v5, %v3242_v4  ;;  %v3226_v15 = vld [vmem:[#allocation5 + $0x208] sm:$0xf] }
  0xa0   :  { %1893 = vmatpush.bf16.msra.mxu0 %v3051_v16  ;;  %v3371_v16 = vor.u32 %v4465_v7, %v3370_v6  ;;  %v4461_v23 = vld [vmem:[#allocation5 + $0x314] sm:$0xf0]  ;;  %v3594_v24 = vld [vmem:[#allocation5 + $0x4e8] sm:$0xf]  ;;  %v2971_v27 = vor.u32 %v4365_v10, %v2970_v9 }
  0xa1   :  { %v4521_v25 = vld [vmem:[#allocation5 + $0x4f4] sm:$0xf0]  ;;  %v3850_v29 = vld [vmem:[#allocation5 + $0x6e8] sm:$0xf] }
  0xa2   :  { %1906 = vmatpush.bf16.msra.mxu1 %v3179_v17  ;;  %1919 = vmatpush.bf16.msra.mxu2 %v3307_v21  ;;  %v4429_v17 = vld [vmem:[#allocation5 + $0x214] sm:$0xf0]  ;;  %v3354_v21 = vld [vmem:[#allocation5 + $0x308] sm:$0xf]  ;;  %v3595_v36 = vor.u32 %v4521_v25, %v3594_v24 }
  0xa3   :  { %1932 = vmatpush.bf16.msra.mxu3 %v3435_v26  ;;  %v3722_v26 = vld [vmem:[#allocation5 + $0x5e8] sm:$0xf]  ;;  %v4553_v28 = vld [vmem:[#allocation5 + $0x5f4] sm:$0xf0]  ;;  %v3355_v35 = vor.u32 %v4461_v23, %v3354_v21 }
  0xa4   :  { %1894 = vmatpush.bf16.msra.mxu0 %v3035_v32  ;;  %v4585_v30 = vld [vmem:[#allocation5 + $0x6f4] sm:$0xf0]  ;;  %v3227_v32 = vor.u32 %v4429_v17, %v3226_v15  ;;  %v3723_v37 = vor.u32 %v4553_v28, %v3722_v26  ;;  %v3578_v40 = vld [vmem:[#allocation5 + $0x4c8] sm:$0xf]  ;;  %v4984_v26 = vld [vmem:[%s5143_s2] sm:$0xf] }
  0xa5   :  { %v4517_v43 = vld [vmem:[#allocation5 + $0x4d4] sm:$0xf0]  ;;  %v3706_v45 = vld [vmem:[#allocation5 + $0x5c8] sm:$0xf] }
  0xa6   :  { %1907 = vmatpush.bf16.msra.mxu1 %v3163_v33  ;;  %1920 = vmatpush.bf16.msra.mxu2 %v3291_v34  ;;  %v3978_v33 = vld [vmem:[#allocation5 + $0x7e8] sm:$0xf]  ;;  %v4617_v34 = vld [vmem:[#allocation5 + $0x7f4] sm:$0xf0]  ;;  %v3579_v52 = vor.u32 %v4517_v43, %v3578_v40 }
  0xa7   :  { %1933 = vmatpush.bf16.msra.mxu3 %v3419_v39  ;;  %v3851_v39 = vor.u32 %v4585_v30, %v3850_v29  ;;  %v3979_v46 = vor.u32 %v4617_v34, %v3978_v33  ;;  %v4549_v47 = vld [vmem:[#allocation5 + $0x5d4] sm:$0xf0]  ;;  %v3562_v55 = vld [vmem:[#allocation5 + $0x4a8] sm:$0xf] }
  0xa8   :  { %1895 = vmatpush.bf16.msra.mxu0 %v3019_v48  ;;  %v3834_v48 = vld [vmem:[#allocation5 + $0x6c8] sm:$0xf]  ;;  %v4613_v51 = vld [vmem:[#allocation5 + $0x7d4] sm:$0xf0]  ;;  %v3707_v53 = vor.u32 %v4549_v47, %v3706_v45 }
  0xa9   :  { %v4513_v56 = vld [vmem:[#allocation5 + $0x4b4] sm:$0xf0]  ;;  %v3690_v57 = vld [vmem:[#allocation5 + $0x5a8] sm:$0xf] }
  0xaa   :  { %1908 = vmatpush.bf16.msra.mxu1 %v3147_v49  ;;  %1921 = vmatpush.bf16.msra.mxu2 %v3275_v50  ;;  %v4581_v49 = vld [vmem:[#allocation5 + $0x6d4] sm:$0xf0]  ;;  %v3962_v50 = vld [vmem:[#allocation5 + $0x7c8] sm:$0xf]  ;;  %v3563_v0 = vor.u32 %v4513_v56, %v3562_v55 }
  0xab   :  { %1934 = vmatpush.bf16.msra.mxu3 %v3403_v54  ;;  %v3835_v54 = vor.u32 %v4581_v49, %v3834_v48  ;;  %v3963_v58 = vor.u32 %v4613_v51, %v3962_v50  ;;  %v4545_v59 = vld [vmem:[#allocation5 + $0x5b4] sm:$0xf0]  ;;  %v3546_v3 = vld [vmem:[#allocation5 + $0x488] sm:$0xf] }
  0xac   :  { %1896 = vmatpush.bf16.msra.mxu0 %v3003_v60  ;;  %v3818_v60 = vld [vmem:[#allocation5 + $0x6a8] sm:$0xf]  ;;  %v4609_v63 = vld [vmem:[#allocation5 + $0x7b4] sm:$0xf0]  ;;  %v3691_v1 = vor.u32 %v4545_v59, %v3690_v57 }
  0xad   :  { %v4509_v4 = vld [vmem:[#allocation5 + $0x494] sm:$0xf0]  ;;  %v3674_v5 = vld [vmem:[#allocation5 + $0x588] sm:$0xf] }
  0xae   :  { %1909 = vmatpush.bf16.msra.mxu1 %v3131_v61  ;;  %1922 = vmatpush.bf16.msra.mxu2 %v3259_v62  ;;  %v4577_v61 = vld [vmem:[#allocation5 + $0x6b4] sm:$0xf0]  ;;  %v3946_v62 = vld [vmem:[#allocation5 + $0x7a8] sm:$0xf] }
  0xaf   :  { %1935 = vmatpush.bf16.msra.mxu3 %v3387_v2  ;;  %v3819_v2 = vor.u32 %v4577_v61, %v3818_v60  ;;  %v3947_v6 = vor.u32 %v4609_v63, %v3946_v62  ;;  %v4541_v7 = vld [vmem:[#allocation5 + $0x594] sm:$0xf0]  ;;  %v3930_v10 = vld [vmem:[#allocation5 + $0x788] sm:$0xf] }
  0xb0   :  { %1897 = vmatpush.bf16.msra.mxu0 %v2987_v8  ;;  %v3802_v8 = vld [vmem:[#allocation5 + $0x688] sm:$0xf]  ;;  %v4573_v9 = vld [vmem:[#allocation5 + $0x694] sm:$0xf0]  ;;  %v3675_v14 = vor.u32 %v4541_v7, %v3674_v5 }
  0xb1   :  { %v3530_v13 = vld [vmem:[#allocation5 + $0x468] sm:$0xf]  ;;  %v3803_v15 = vor.u32 %v4573_v9, %v3802_v8  ;;  %v4537_v21 = vld [vmem:[#allocation5 + $0x574] sm:$0xf0] }
  0xb2   :  { %1910 = vmatpush.bf16.msra.mxu1 %v3115_v11  ;;  %1923 = vmatpush.bf16.msra.mxu2 %v3243_v12  ;;  %v4605_v11 = vld [vmem:[#allocation5 + $0x794] sm:$0xf0]  ;;  %v3547_v12 = vor.u32 %v4509_v4, %v3546_v3  ;;  %v3658_v17 = vld [vmem:[#allocation5 + $0x568] sm:$0xf] }
  0xb3   :  { %1936 = vmatpush.bf16.msra.mxu3 %v3371_v16  ;;  %v4505_v16 = vld [vmem:[#allocation5 + $0x474] sm:$0xf0]  ;;  %v3931_v23 = vor.u32 %v4605_v11, %v3930_v10  ;;  %v3786_v24 = vld [vmem:[#allocation5 + $0x668] sm:$0xf] }
  0xb4   :  { %1898 = vmatpush.bf16.msra.mxu0 %v2971_v27  ;;  %v4569_v25 = vld [vmem:[#allocation5 + $0x674] sm:$0xf0]  ;;  %v3914_v27 = vld [vmem:[#allocation5 + $0x768] sm:$0xf]  ;;  %v3531_v29 = vor.u32 %v4505_v16, %v3530_v13  ;;  %v4391_v13 = vld [vmem:[#allocation5 + $0xec] sm:$0xf] }
  0xb5   :  { %v4601_v28 = vld [vmem:[#allocation5 + $0x774] sm:$0xf0]  ;;  %v3514_v30 = vld [vmem:[#allocation5 + $0x448] sm:$0xf] }
  0xb6   :  { %1911 = vmatpush.bf16.msra.mxu1 %v3099_v31  ;;  %1924 = vmatpush.bf16.msra.mxu2 %v3227_v32  ;;  %v3659_v31 = vor.u32 %v4537_v21, %v3658_v17  ;;  %v3787_v32 = vor.u32 %v4569_v25, %v3786_v24  ;;  %v4501_v33 = vld [vmem:[#allocation5 + $0x454] sm:$0xf0]  ;;  %v3642_v34 = vld [vmem:[#allocation5 + $0x548] sm:$0xf]  ;;  %v3212_v17 = vld [vmem:[#allocation5 + $0x1f8] sm:$0xf0] }
  0xb7   :  { %1937 = vmatpush.bf16.msra.mxu3 %v3355_v35  ;;  %1899 = vmatmul.bf16.vlgmr.msra.gmra.mxu0 %v4947_v19  ;;  %v367_v35 = vperm.slane %v4984_v26, 0  ;;  %v4565_v40 = vld [vmem:[#allocation5 + $0x654] sm:$0xf0]  ;;  %v3898_v43 = vld [vmem:[#allocation5 + $0x748] sm:$0xf] }
  0xb8   :  { %1943 = vmatpush.bf16.msrb.mxu0 %v3595_v36  ;;  %v3915_v36 = vor.u32 %v4601_v28, %v3914_v27  ;;  %v4597_v45 = vld [vmem:[#allocation5 + $0x754] sm:$0xf0]  ;;  %v3498_v50 = vld [vmem:[#allocation5 + $0x428] sm:$0xf]  ;;  %v4455_v21 = vld [vmem:[#allocation5 + $0x2ec] sm:$0xf] }
  0xb9   :  { %1925 = vmatmul.bf16.vlgmr.msra.gmra.mxu2 %v4945_v18  ;;  %1912 = vmatmul.bf16.vlgmr.msra.gmra.mxu1 %v4951_v22  ;;  %v4497_v51 = vld [vmem:[#allocation5 + $0x434] sm:$0xf0]  ;;  %v3899_v55 = vor.u32 %v4597_v45, %v3898_v43  ;;  %v3754_v57 = vld [vmem:[#allocation5 + $0x628] sm:$0xf]  ;;  %v3196_v43 = vld [vmem:[#allocation5 + $0x1d8] sm:$0xf0] }
  0xba   :  { %1956 = vmatpush.bf16.msrb.mxu1 %v3723_v37  ;;  %1969 = vmatpush.bf16.msrb.mxu2 %v3851_v39  ;;  %v4533_v37 = vld [vmem:[#allocation5 + $0x554] sm:$0xf0]  ;;  %v3770_v39 = vld [vmem:[#allocation5 + $0x648] sm:$0xf]  ;;  %v3499_v62 = vor.u32 %v4497_v51, %v3498_v50  ;;  %v4451_v45 = vld [vmem:[#allocation5 + $0x2cc] sm:$0xf] }
  0xbb   :  { %1982 = vmatpush.bf16.msrb.mxu3 %v3979_v46  ;;  %v3515_v46 = vor.u32 %v4501_v33, %v3514_v30  ;;  %v3643_v48 = vor.u32 %v4533_v37, %v3642_v34  ;;  %v3771_v49 = vor.u32 %v4565_v40, %v3770_v39  ;;  %v4529_v56 = vld [vmem:[#allocation5 + $0x534] sm:$0xf0]  ;;  %v3882_v59 = vld [vmem:[#allocation5 + $0x728] sm:$0xf]  ;;  %v3468_v30 = vld [vmem:[#allocation5 + $0x3f8] sm:$0xf0] }
  0xbc   :  { %1938 = vmatmul.bf16.vlgmr.msra.gmra.mxu3 %v4949_v20  ;;  %1944 = vmatpush.bf16.msrb.mxu0 %v3579_v52  ;;  %v3626_v52 = vld [vmem:[#allocation5 + $0x528] sm:$0xf]  ;;  %v4593_v60 = vld [vmem:[#allocation5 + $0x734] sm:$0xf0]  ;;  %v3068_v37 = vld [vmem:[#allocation5 + $0xd8] sm:$0xf0] }
  0xbd   :  { %v3482_v63 = vld [vmem:[#allocation5 + $0x408] sm:$0xf]  ;;  %v4525_v4 = vld [vmem:[#allocation5 + $0x514] sm:$0xf0]  ;;  %v3883_v7 = vor.u32 %v4593_v60, %v3882_v59  ;;  %v4419_v39 = vld [vmem:[#allocation5 + $0x1cc] sm:$0xf] }
  0xbe   :  { %1957 = vmatpush.bf16.msrb.mxu1 %v3707_v53  ;;  %1970 = vmatpush.bf16.msrb.mxu2 %v3835_v54  ;;  %v3610_v3 = vld [vmem:[#allocation5 + $0x508] sm:$0xf]  ;;  %v4557_v8 = vld [vmem:[#allocation5 + $0x614] sm:$0xf0]  ;;  %v4447_v59 = vld [vmem:[#allocation5 + $0x2ac] sm:$0xf] }
  0xbf   :  { %1983 = vmatpush.bf16.msrb.mxu3 %v3963_v58  ;;  %v4561_v58 = vld [vmem:[#allocation5 + $0x634] sm:$0xf0]  ;;  %v3738_v5 = vld [vmem:[#allocation5 + $0x608] sm:$0xf]  ;;  %v3611_v27 = vor.u32 %v4525_v4, %v3610_v3  ;;  %v3308_v60 = vld [vmem:[#allocation5 + $0x2b8] sm:$0xf0] }
  0xc0   :  { %1945 = vmatpush.bf16.msrb.mxu0 %v3563_v0  ;;  %v4493_v0 = vld [vmem:[#allocation5 + $0x414] sm:$0xf0]  ;;  %v3866_v9 = vld [vmem:[#allocation5 + $0x708] sm:$0xf]  ;;  %v3739_v28 = vor.u32 %v4557_v8, %v3738_v5  ;;  %v3036_v3 = vld [vmem:[#allocation5 + $0x98] sm:$0xf0] }
  0xc1   :  { %v4589_v10 = vld [vmem:[#allocation5 + $0x714] sm:$0xf0]  ;;  %v3483_v16 = vor.u32 %v4493_v0, %v3482_v63  ;;  %v4411_v4 = vld [vmem:[#allocation5 + $0x18c] sm:$0xf]  ;;  %v3292_v8 = vld [vmem:[#allocation5 + $0x298] sm:$0xf0] }
  0xc2   :  { %1958 = vmatpush.bf16.msrb.mxu1 %v3691_v1  ;;  %1971 = vmatpush.bf16.msrb.mxu2 %v3819_v2  ;;  %v1692_v47 = vpop.f32.mrf.mxu0  ;;  %v1705_v54 = vpop.f32.mrf.mxu1  ;;  %v3627_v1 = vor.u32 %v4529_v56, %v3626_v52  ;;  %v3755_v2 = vor.u32 %v4561_v58, %v3754_v57  ;;  %v3199_v52 = vor.u32 %v4419_v39, %v3196_v43  ;;  %v4415_v56 = vld [vmem:[#allocation5 + $0x1ac] sm:$0xf]  ;;  %v3180_v58 = vld [vmem:[#allocation5 + $0x1b8] sm:$0xf0] }
  0xc3   :  { %1984 = vmatpush.bf16.msrb.mxu3 %v3947_v6  ;;  %v1693_v53 = vadd.f32 %v1692_v47, %v367_v35  ;;  %v1718_v6 = vpop.f32.mrf.mxu2  ;;  %v4483_v47 = vld [vmem:[#allocation5 + $0x3cc] sm:$0xf]  ;;  %v3183_v0 = vor.u32 %v4415_v56, %v3180_v58  ;;  %v3132_v43 = vld [vmem:[#allocation5 + $0x158] sm:$0xf0] }
  0xc4   :  { %1946 = vmatpush.bf16.msrb.mxu0 %v3547_v12  ;;  %v1731_v12 = vpop.f32.mrf.mxu3  ;;  %v4403_v39 = vld [vmem:[#allocation5 + $0x14c] sm:$0xf] }
  0xc5   :  { %v1706_v61 = vadd.f32 %v1705_v54, %v1693_v53  ;;  %v4383_v54 = vld [vmem:[#allocation5 + $0xac] sm:$0xf] }
  0xc6   :  { %1959 = vmatpush.bf16.msrb.mxu1 %v3675_v14  ;;  %1972 = vmatpush.bf16.msrb.mxu2 %v3803_v15  ;;  %v3084_v14 = vld [vmem:[#allocation5 + $0xf8] sm:$0xf0]  ;;  %v4423_v15 = vld [vmem:[#allocation5 + $0x1ec] sm:$0xf] }
  0xc7   :  { %1985 = vmatpush.bf16.msrb.mxu3 %v3931_v23  ;;  %v1719_v11 = vadd.f32 %v1718_v6, %v1706_v61  ;;  %v3340_v23 = vld [vmem:[#allocation5 + $0x2f8] sm:$0xf0]  ;;  %v3087_v33 = vor.u32 %v4391_v13, %v3084_v14  ;;  %v3215_v34 = vor.u32 %v4423_v15, %v3212_v17  ;;  %v4479_v61 = vld [vmem:[#allocation5 + $0x3ac] sm:$0xf] }
  0xc8   :  { %1947 = vmatpush.bf16.msrb.mxu0 %v3531_v29  ;;  %v4487_v29 = vld [vmem:[#allocation5 + $0x3ec] sm:$0xf]  ;;  %v3343_v35 = vor.u32 %v4455_v21, %v3340_v23  ;;  %v3164_v6 = vld [vmem:[#allocation5 + $0x198] sm:$0xf0] }
  0xc9   :  { %v4987_v24 = vadd.f32 %v1731_v12, %v1719_v11  ;;  %v3471_v40 = vor.u32 %v4487_v29, %v3468_v30  ;;  %v3167_v13 = vor.u32 %v4411_v4, %v3164_v6  ;;  %v4375_v15 = vld [vmem:[#allocation5 + $0x6c] sm:$0xf]  ;;  %v3276_v29 = vld [vmem:[#allocation5 + $0x278] sm:$0xf0] }
  0xca   :  { %1960 = vmatpush.bf16.msrb.mxu1 %v3659_v31  ;;  %1973 = vmatpush.bf16.msrb.mxu2 %v3787_v32  ;;  %v1694_v25 = vpop.f32.mrf.mxu0  ;;  %v1707_v31 = vpop.f32.mrf.mxu1  ;;  %v3867_v32 = vor.u32 %v4589_v10, %v3866_v9  ;;  %v4475_v9 = vld [vmem:[#allocation5 + $0x38c] sm:$0xf]  ;;  %v3420_v10 = vld [vmem:[#allocation5 + $0x398] sm:$0xf0] }
  0xcb   :  { %1986 = vmatpush.bf16.msrb.mxu3 %v3915_v36  ;;  %v4387_v36 = vld [vmem:[#allocation5 + $0xcc] sm:$0xf]  ;;  %v3423_v25 = vor.u32 %v4475_v9, %v3420_v10  ;;  %v3404_v31 = vld [vmem:[#allocation5 + $0x378] sm:$0xf0] }
  0xcc   :  { %1948 = vmatpush.bf16.msrb.mxu0 %v3515_v46  ;;  %v3324_v46 = vld [vmem:[#allocation5 + $0x2d8] sm:$0xf0]  ;;  %v3071_v50 = vor.u32 %v4387_v36, %v3068_v37  ;;  %v1733_v51 = vpop.f32.mrf.mxu3  ;;  %v4407_v17 = vld [vmem:[#allocation5 + $0x16c] sm:$0xf] }
  0xcd   :  { %v3327_v53 = vor.u32 %v4451_v45, %v3324_v46  ;;  %v4471_v30 = vld [vmem:[#allocation5 + $0x36c] sm:$0xf]  ;;  %v3004_v37 = vld [vmem:[#allocation5 + $0x58] sm:$0xf0] }
  0xce   :  { %1961 = vmatpush.bf16.msrb.mxu1 %v3643_v48  ;;  %1974 = vmatpush.bf16.msrb.mxu2 %v3771_v49  ;;  %v3452_v48 = vld [vmem:[#allocation5 + $0x3d8] sm:$0xf0]  ;;  %v1720_v49 = vpop.f32.mrf.mxu2  ;;  %v4371_v36 = vld [vmem:[#allocation5 + $0x4c] sm:$0xf] }
  0xcf   :  { %1987 = vmatpush.bf16.msrb.mxu3 %v3899_v55  ;;  %v3052_v55 = vld [vmem:[#allocation5 + $0xb8] sm:$0xf0]  ;;  %v3455_v57 = vor.u32 %v4483_v47, %v3452_v48  ;;  %v4435_v45 = vld [vmem:[#allocation5 + $0x24c] sm:$0xf]  ;;  %v3007_v51 = vor.u32 %v4371_v36, %v3004_v37 }
  0xd0   :  { %1949 = vmatpush.bf16.msrb.mxu0 %v3499_v62  ;;  %v3436_v62 = vld [vmem:[#allocation5 + $0x3b8] sm:$0xf0]  ;;  %v3055_v63 = vor.u32 %v4383_v54, %v3052_v55  ;;  %v4467_v49 = vld [vmem:[#allocation5 + $0x34c] sm:$0xf]  ;;  %v3135_v54 = vor.u32 %v4403_v39, %v3132_v43 }
  0xd1   :  { %v3439_v5 = vor.u32 %v4479_v61, %v3436_v62  ;;  %v3260_v46 = vld [vmem:[#allocation5 + $0x258] sm:$0xf0]  ;;  %v4367_v56 = vld [vmem:[#allocation5 + $0x2c] sm:$0xf] }
  0xd2   :  { %1962 = vmatpush.bf16.msrb.mxu1 %v3627_v1  ;;  %1975 = vmatpush.bf16.msrb.mxu2 %v3755_v2  ;;  %v3311_v1 = vor.u32 %v4447_v59, %v3308_v60  ;;  %v4379_v2 = vld [vmem:[#allocation5 + $0x8c] sm:$0xf]  ;;  %v3263_v55 = vor.u32 %v4435_v45, %v3260_v46  ;;  %v3116_v61 = vld [vmem:[#allocation5 + $0x138] sm:$0xf0] }
  0xd3   :  { %1988 = vmatpush.bf16.msrb.mxu3 %v3883_v7  ;;  %v4443_v7 = vld [vmem:[#allocation5 + $0x28c] sm:$0xf]  ;;  %v3039_v11 = vor.u32 %v4379_v2, %v3036_v3  ;;  %v2972_v4 = vld [vmem:[#allocation5 + $0x18] sm:$0xf0] }
  0xd4   :  { %1950 = vmatpush.bf16.msrb.mxu0 %v3483_v16  ;;  %v3295_v14 = vor.u32 %v4443_v7, %v3292_v8  ;;  %v3020_v16 = vld [vmem:[#allocation5 + $0x78] sm:$0xf0]  ;;  %v4399_v58 = vld [vmem:[#allocation5 + $0x12c] sm:$0xf] }
  0xd5   :  { %v4431_v62 = vld [vmem:[#allocation5 + $0x22c] sm:$0xf]  ;;  %v3100_v8 = vld [vmem:[#allocation5 + $0x118] sm:$0xf0] }
  0xd6   :  { %1963 = vmatpush.bf16.msrb.mxu1 %v3611_v27  ;;  %1976 = vmatpush.bf16.msrb.mxu2 %v3739_v28  ;;  %v1744_v12 = vpop.f32.mrf.mxu0  ;;  %v3148_v27 = vld [vmem:[#allocation5 + $0x178] sm:$0xf0]  ;;  %v4439_v28 = vld [vmem:[#allocation5 + $0x26c] sm:$0xf] }
  0xd7   :  { %1989 = vmatpush.bf16.msrb.mxu3 %v3867_v32  ;;  %1951 = vmatmul.bf16.vlgmr.msrb.gmra.mxu0 %v4959_v41  ;;  %v1745_v21 = vadd.f32 %v1744_v12, %v4987_v24  ;;  %v3407_v24 = vor.u32 %v4471_v30, %v3404_v31  ;;  %v4363_v3 = vld [vmem:[#allocation5 + $0xc] sm:$0xf]  ;;  %v3228_v12 = vld [vmem:[#allocation5 + $0x218] sm:$0xf0] }
  0xd8   :  { %1995 = vmatpush.bf16.msra.mxu0 %v3087_v33  ;;  %v1757_v23 = vpop.f32.mrf.mxu1  ;;  %v3023_v33 = vor.u32 %v4375_v15, %v3020_v16  ;;  %v4395_v7 = vld [vmem:[#allocation5 + $0x10c] sm:$0xf]  ;;  %v3580_v39 = vld [vmem:[#allocation5 + $0x4d8] sm:$0xf0] }
  0xd9   :  { %1977 = vmatmul.bf16.vlgmr.msrb.gmra.mxu2 %v4957_v38  ;;  %1964 = vmatmul.bf16.vlgmr.msrb.gmra.mxu1 %v4963_v44  ;;  %v1758_v32 = vadd.f32 %v1757_v23, %v1745_v21  ;;  %v4427_v9 = vld [vmem:[#allocation5 + $0x20c] sm:$0xf]  ;;  %v2975_v23 = vor.u32 %v4363_v3, %v2972_v4  ;;  %v3708_v43 = vld [vmem:[#allocation5 + $0x5d8] sm:$0xf0] }
  0xda   :  { %2008 = vmatpush.bf16.msra.mxu1 %v3215_v34  ;;  %2021 = vmatpush.bf16.msra.mxu2 %v3343_v35  ;;  %v3151_v34 = vor.u32 %v4407_v17, %v3148_v27  ;;  %v3279_v35 = vor.u32 %v4439_v28, %v3276_v29  ;;  %v4519_v16 = vld [vmem:[#allocation5 + $0x4ec] sm:$0xf]  ;;  %v3596_v17 = vld [vmem:[#allocation5 + $0x4f8] sm:$0xf0]  ;;  %v3103_v29 = vor.u32 %v4395_v7, %v3100_v8 }
  0xdb   :  { %2034 = vmatpush.bf16.msra.mxu3 %v3471_v40  ;;  %v4551_v21 = vld [vmem:[#allocation5 + $0x5ec] sm:$0xf]  ;;  %v3852_v28 = vld [vmem:[#allocation5 + $0x6f8] sm:$0xf0]  ;;  %v3231_v30 = vor.u32 %v4427_v9, %v3228_v12 }
  0xdc   :  { %1990 = vmatmul.bf16.vlgmr.msrb.gmra.mxu3 %v4961_v42  ;;  %1996 = vmatpush.bf16.msra.mxu0 %v3071_v50  ;;  %v1770_v40 = vpop.f32.mrf.mxu2  ;;  %v3388_v50 = vld [vmem:[#allocation5 + $0x358] sm:$0xf0]  ;;  %v4583_v27 = vld [vmem:[#allocation5 + $0x6ec] sm:$0xf] }
  0xdd   :  { %v1771_v47 = vadd.f32 %v1770_v40, %v1758_v32  ;;  %v3391_v60 = vor.u32 %v4467_v49, %v3388_v50  ;;  %v4615_v31 = vld [vmem:[#allocation5 + $0x7ec] sm:$0xf]  ;;  %v3980_v32 = vld [vmem:[#allocation5 + $0x7f8] sm:$0xf0]  ;;  %v3855_v36 = vor.u32 %v4583_v27, %v3852_v28 }
  0xde   :  { %2009 = vmatpush.bf16.msra.mxu1 %v3199_v52  ;;  %2022 = vmatpush.bf16.msra.mxu2 %v3327_v53  ;;  %v1746_v53 = vpop.f32.mrf.mxu0  ;;  %v4515_v37 = vld [vmem:[#allocation5 + $0x4cc] sm:$0xf]  ;;  %v3836_v46 = vld [vmem:[#allocation5 + $0x6d8] sm:$0xf0] }
  0xdf   :  { %2035 = vmatpush.bf16.msra.mxu3 %v3455_v57  ;;  %v1783_v48 = vpop.f32.mrf.mxu3  ;;  %v2988_v57 = vld [vmem:[#allocation5 + $0x38] sm:$0xf0]  ;;  %v4547_v40 = vld [vmem:[#allocation5 + $0x5cc] sm:$0xf]  ;;  %v3583_v49 = vor.u32 %v4515_v37, %v3580_v39 }
  0xe0   :  { %1997 = vmatpush.bf16.msra.mxu0 %v3055_v63  ;;  %v4994_v52 = vadd.f32 %v1783_v48, %v1771_v47  ;;  %v1759_v59 = vpop.f32.mrf.mxu1  ;;  %v3244_v63 = vld [vmem:[#allocation5 + $0x238] sm:$0xf0]  ;;  %v2991_v2 = vor.u32 %v4367_v56, %v2988_v57  ;;  %v4579_v45 = vld [vmem:[#allocation5 + $0x6cc] sm:$0xf]  ;;  %v3711_v50 = vor.u32 %v4547_v40, %v3708_v43 }
  0xe1   :  { %v3247_v6 = vor.u32 %v4431_v62, %v3244_v63  ;;  %v4611_v47 = vld [vmem:[#allocation5 + $0x7cc] sm:$0xf]  ;;  %v3964_v48 = vld [vmem:[#allocation5 + $0x7d8] sm:$0xf0] }
  0xe2   :  { %2010 = vmatpush.bf16.msra.mxu1 %v3183_v0  ;;  %2023 = vmatpush.bf16.msra.mxu2 %v3311_v1  ;;  %v4463_v0 = vld [vmem:[#allocation5 + $0x32c] sm:$0xf]  ;;  %v3372_v1 = vld [vmem:[#allocation5 + $0x338] sm:$0xf0]  ;;  %v3967_v56 = vor.u32 %v4611_v47, %v3964_v48 }
  0xe3   :  { %2036 = vmatpush.bf16.msra.mxu3 %v3439_v5  ;;  %v3119_v5 = vor.u32 %v4399_v58, %v3116_v61  ;;  %v4511_v53 = vld [vmem:[#allocation5 + $0x4ac] sm:$0xf]  ;;  %v3692_v57 = vld [vmem:[#allocation5 + $0x5b8] sm:$0xf0] }
  0xe4   :  { %1998 = vmatpush.bf16.msra.mxu0 %v3039_v11  ;;  %v1772_v10 = vpop.f32.mrf.mxu2  ;;  %v3375_v11 = vor.u32 %v4463_v0, %v3372_v1  ;;  %v4575_v58 = vld [vmem:[#allocation5 + $0x6ac] sm:$0xf]  ;;  %v3820_v59 = vld [vmem:[#allocation5 + $0x6b8] sm:$0xf0] }
  0xe5   :  { %v3948_v61 = vld [vmem:[#allocation5 + $0x7b8] sm:$0xf0]  ;;  %v3823_v0 = vor.u32 %v4575_v58, %v3820_v59  ;;  %v4507_v1 = vld [vmem:[#allocation5 + $0x48c] sm:$0xf]  ;;  %v368_v58 = vperm.slane %v4984_v26, 1 }
  0xe6   :  { %2011 = vmatpush.bf16.msra.mxu1 %v3167_v13  ;;  %2024 = vmatpush.bf16.msra.mxu2 %v3295_v14  ;;  %v4459_v13 = vld [vmem:[#allocation5 + $0x30c] sm:$0xf]  ;;  %v3356_v14 = vld [vmem:[#allocation5 + $0x318] sm:$0xf0]  ;;  %v4633_v26 = vld [vmem:[#allocation7 + $0x74] sm:$0xf0] }
  0xe7   :  { %2037 = vmatpush.bf16.msra.mxu3 %v3423_v25  ;;  %v1785_v15 = vpop.f32.mrf.mxu3  ;;  %v3724_v25 = vld [vmem:[#allocation5 + $0x5f8] sm:$0xf0]  ;;  %v4603_v7 = vld [vmem:[#allocation5 + $0x78c] sm:$0xf] }
  0xe8   :  { %1999 = vmatpush.bf16.msra.mxu0 %v3023_v33  ;;  %v3359_v33 = vor.u32 %v4459_v13, %v3356_v14  ;;  %v3676_v4 = vld [vmem:[#allocation5 + $0x598] sm:$0xf0]  ;;  %v4503_v10 = vld [vmem:[#allocation5 + $0x46c] sm:$0xf] }
  0xe9   :  { %v4535_v12 = vld [vmem:[#allocation5 + $0x56c] sm:$0xf]  ;;  %v3660_v15 = vld [vmem:[#allocation5 + $0x578] sm:$0xf0] }
  0xea   :  { %2012 = vmatpush.bf16.msra.mxu1 %v3151_v34  ;;  %2025 = vmatpush.bf16.msra.mxu2 %v3279_v35  ;;  %v3599_v34 = vor.u32 %v4519_v16, %v3596_v17  ;;  %v3727_v35 = vor.u32 %v4551_v21, %v3724_v25  ;;  %v4567_v16 = vld [vmem:[#allocation5 + $0x66c] sm:$0xf]  ;;  %v3788_v17 = vld [vmem:[#allocation5 + $0x678] sm:$0xf0]  ;;  %v3663_v27 = vor.u32 %v4535_v12, %v3660_v15 }
  0xeb   :  { %2038 = vmatpush.bf16.msra.mxu3 %v3407_v24  ;;  %v3983_v24 = vor.u32 %v4615_v31, %v3980_v32  ;;  %v4599_v21 = vld [vmem:[#allocation5 + $0x76c] sm:$0xf]  ;;  %v3791_v28 = vor.u32 %v4567_v16, %v3788_v17  ;;  %v3900_v40 = vld [vmem:[#allocation5 + $0x758] sm:$0xf0] }
  0xec   :  { %2000 = vmatpush.bf16.msra.mxu0 %v3007_v51  ;;  %v3839_v51 = vor.u32 %v4579_v45, %v3836_v46  ;;  %v4531_v31 = vld [vmem:[#allocation5 + $0x54c] sm:$0xf]  ;;  %v3500_v48 = vld [vmem:[#allocation5 + $0x438] sm:$0xf0] }
  0xed   :  { %v4595_v39 = vld [vmem:[#allocation5 + $0x74c] sm:$0xf] }
  0xee   :  { %2013 = vmatpush.bf16.msra.mxu1 %v3135_v54  ;;  %2026 = vmatpush.bf16.msra.mxu2 %v3263_v55  ;;  %v3564_v54 = vld [vmem:[#allocation5 + $0x4b8] sm:$0xf0]  ;;  %v4543_v55 = vld [vmem:[#allocation5 + $0x5ac] sm:$0xf] }
  0xef   :  { %2039 = vmatpush.bf16.msra.mxu3 %v3391_v60  ;;  %v4607_v60 = vld [vmem:[#allocation5 + $0x7ac] sm:$0xf]  ;;  %v3567_v62 = vor.u32 %v4511_v53, %v3564_v54  ;;  %v3695_v63 = vor.u32 %v4543_v55, %v3692_v57  ;;  %v3628_v53 = vld [vmem:[#allocation5 + $0x538] sm:$0xf0] }
  0xf0   :  { %2001 = vmatpush.bf16.msra.mxu0 %v2991_v2  ;;  %v3548_v2 = vld [vmem:[#allocation5 + $0x498] sm:$0xf0]  ;;  %v3951_v3 = vor.u32 %v4607_v60, %v3948_v61  ;;  %v4495_v47 = vld [vmem:[#allocation5 + $0x42c] sm:$0xf] }
  0xf1   :  { %v4559_v54 = vld [vmem:[#allocation5 + $0x62c] sm:$0xf]  ;;  %v3756_v55 = vld [vmem:[#allocation5 + $0x638] sm:$0xf0]  ;;  %v3503_v59 = vor.u32 %v4495_v47, %v3500_v48  ;;  %v4010_v47 = vld [vmem:[#allocation7 + $0x30] sm:$0xf] }
  0xf2   :  { %2014 = vmatpush.bf16.msra.mxu1 %v3119_v5  ;;  %2027 = vmatpush.bf16.msra.mxu2 %v3247_v6  ;;  %v4571_v5 = vld [vmem:[#allocation5 + $0x68c] sm:$0xf]  ;;  %v3804_v6 = vld [vmem:[#allocation5 + $0x698] sm:$0xf0]  ;;  %v4074_v48 = vld [vmem:[#allocation7 + $0xb0] sm:$0xf] }
  0xf3   :  { %2040 = vmatpush.bf16.msra.mxu3 %v3375_v11  ;;  %v3807_v9 = vor.u32 %v4571_v5, %v3804_v6  ;;  %v3532_v11 = vld [vmem:[#allocation5 + $0x478] sm:$0xf0]  ;;  %v4491_v60 = vld [vmem:[#allocation5 + $0x40c] sm:$0xf] }
  0xf4   :  { %2002 = vmatpush.bf16.msra.mxu0 %v2975_v23  ;;  %v5000_v8 = vpop.f32.mrf.mxu0  ;;  %v3916_v23 = vld [vmem:[#allocation5 + $0x778] sm:$0xf0]  ;;  %v3535_v25 = vor.u32 %v4503_v10, %v3532_v11  ;;  %v4587_v5 = vld [vmem:[#allocation5 + $0x70c] sm:$0xf]  ;;  %v4649_v10 = vld [vmem:[#allocation7 + $0xf4] sm:$0xf0] }
  0xf5   :  { %v3884_v57 = vld [vmem:[#allocation5 + $0x738] sm:$0xf0] }
  0xf6   :  { %2015 = vmatpush.bf16.msra.mxu1 %v3103_v29  ;;  %2028 = vmatpush.bf16.msra.mxu2 %v3231_v30  ;;  %v5002_v13 = vpop.f32.mrf.mxu1  ;;  %v4499_v29 = vld [vmem:[#allocation5 + $0x44c] sm:$0xf]  ;;  %v3516_v30 = vld [vmem:[#allocation5 + $0x458] sm:$0xf0] }
  0xf7   :  { %2041 = vmatpush.bf16.msra.mxu3 %v3359_v33  ;;  %2003 = vmatmul.bf16.vlgmr.msra.gmra.mxu0 %v4947_v19  ;;  %v3932_v19 = vld [vmem:[#allocation5 + $0x798] sm:$0xf0]  ;;  %v3919_v33 = vor.u32 %v4599_v21, %v3916_v23  ;;  %v4034_v21 = vld [vmem:[#allocation7 + $0x60] sm:$0xf]  ;;  %v4631_v23 = vld [vmem:[#allocation7 + $0x64] sm:$0xf0] }
  0xf8   :  { %2047 = vmatpush.bf16.msrb.mxu0 %v3599_v34  ;;  %v3935_v14 = vor.u32 %v4603_v7, %v3932_v19  ;;  %v3644_v34 = vld [vmem:[#allocation5 + $0x558] sm:$0xf0]  ;;  %v4042_v19 = vld [vmem:[#allocation7 + $0x70] sm:$0xf] }
  0xf9   :  { %2029 = vmatmul.bf16.vlgmr.msra.gmra.mxu2 %v4945_v18  ;;  %2016 = vmatmul.bf16.vlgmr.msra.gmra.mxu1 %v4951_v22  ;;  %v4539_v18 = vld [vmem:[#allocation5 + $0x58c] sm:$0xf]  ;;  %v3647_v45 = vor.u32 %v4531_v31, %v3644_v34  ;;  %v3868_v7 = vld [vmem:[#allocation5 + $0x718] sm:$0xf0]  ;;  %v4043_v15 = vor.u32 %v4633_v26, %v4042_v19  ;;  %v4629_v31 = vld [vmem:[#allocation7 + $0x54] sm:$0xf0] }
  0xfa   :  { %2060 = vmatpush.bf16.msrb.mxu1 %v3727_v35  ;;  %2073 = vmatpush.bf16.msrb.mxu2 %v3855_v36  ;;  %v3679_v22 = vor.u32 %v4539_v18, %v3676_v4  ;;  %v4563_v35 = vld [vmem:[#allocation5 + $0x64c] sm:$0xf]  ;;  %v3772_v36 = vld [vmem:[#allocation5 + $0x658] sm:$0xf0]  ;;  %v4058_v19 = vld [vmem:[#allocation7 + $0x90] sm:$0xf] }
  0xfb   :  { %2086 = vmatpush.bf16.msrb.mxu3 %v3983_v24  ;;  %v3519_v24 = vor.u32 %v4499_v29, %v3516_v30  ;;  %v3775_v46 = vor.u32 %v4563_v35, %v3772_v36  ;;  %v3740_v4 = vld [vmem:[#allocation5 + $0x618] sm:$0xf0]  ;;  %v4026_v30 = vld [vmem:[#allocation7 + $0x50] sm:$0xf] }
  0xfc   :  { %2042 = vmatmul.bf16.vlgmr.msra.gmra.mxu3 %v4949_v20  ;;  %2048 = vmatpush.bf16.msrb.mxu0 %v3583_v49  ;;  %v3551_v20 = vor.u32 %v4507_v1, %v3548_v2  ;;  %v5004_v32 = vpop.f32.mrf.mxu2  ;;  %v1798_v43 = vpop.f32.mrf.mxu0  ;;  %v4527_v49 = vld [vmem:[#allocation5 + $0x52c] sm:$0xf]  ;;  %v3612_v1 = vld [vmem:[#allocation5 + $0x518] sm:$0xf0]  ;;  %v4027_v34 = vor.u32 %v4629_v31, %v4026_v30  ;;  %v4648_v30 = vld [vmem:[#allocation7 + $0xf4] sm:$0xf] }
  0xfd   :  { %v3631_v61 = vor.u32 %v4527_v49, %v3628_v53  ;;  %v4665_v43 = vld [vmem:[#allocation7 + $0x174] sm:$0xf0]  ;;  %v4663_v53 = vld [vmem:[#allocation7 + $0x164] sm:$0xf0]  ;;  %v4108_v31 = vld [vmem:[#allocation7 + $0xf8] sm:$0xf0] }
  0xfe   :  { %2061 = vmatpush.bf16.msrb.mxu1 %v3711_v50  ;;  %2074 = vmatpush.bf16.msrb.mxu2 %v3839_v51  ;;  %v1811_v50 = vpop.f32.mrf.mxu1  ;;  %v3903_v51 = vor.u32 %v4595_v39, %v3900_v40  ;;  %v4627_v39 = vld [vmem:[#allocation7 + $0x44] sm:$0xf0]  ;;  %v4082_v40 = vld [vmem:[#allocation7 + $0xc0] sm:$0xf] }
  0xff   :  { %2087 = vmatpush.bf16.msrb.mxu3 %v3967_v56  ;;  %v5006_v37 = vpop.f32.mrf.mxu3  ;;  %v4591_v56 = vld [vmem:[#allocation5 + $0x72c] sm:$0xf] }
 0x100   :  { %2049 = vmatpush.bf16.msrb.mxu0 %v3567_v62  ;;  %v3759_v62 = vor.u32 %v4559_v54, %v3756_v55  ;;  %v3887_v18 = vor.u32 %v4591_v56, %v3884_v57 }
 0x102   :  { %2062 = vmatpush.bf16.msrb.mxu1 %v3695_v63  ;;  %2075 = vmatpush.bf16.msrb.mxu2 %v3823_v0  ;;  %v3484_v63 = vld [vmem:[#allocation5 + $0x418] sm:$0xf0]  ;;  %v4523_v0 = vld [vmem:[#allocation5 + $0x50c] sm:$0xf] }
 0x103   :  { %2088 = vmatpush.bf16.msrb.mxu3 %v3951_v3  ;;  %v4555_v3 = vld [vmem:[#allocation5 + $0x60c] sm:$0xf]  ;;  %v3615_v11 = vor.u32 %v4523_v0, %v3612_v1  ;;  %v4154_v0 = vld [vmem:[#allocation7 + $0x150] sm:$0xf]  ;;  %v4661_v1 = vld [vmem:[#allocation7 + $0x154] sm:$0xf0] }
 0x104   :  { %2050 = vmatpush.bf16.msrb.mxu0 %v3551_v20  ;;  %v1824_v2 = vpop.f32.mrf.mxu2  ;;  %v1797_v20 = vadd.f32 %v5000_v8, %v368_v58  ;;  %v3743_v12 = vor.u32 %v4555_v3, %v3740_v4  ;;  %v4035_v8 = vor.u32 %v4631_v23, %v4034_v21  ;;  %v4002_v58 = vld [vmem:[#allocation7 + $0x20] sm:$0xf]  ;;  %v4635_v21 = vld [vmem:[#allocation7 + $0x84] sm:$0xf0]  ;;  %v4632_v23 = vld [vmem:[#allocation7 + $0x74] sm:$0xf] }
 0x105   :  { %v4155_v2 = vor.u32 %v4661_v1, %v4154_v0  ;;  %v4642_v0 = vld [vmem:[#allocation7 + $0xc4] sm:$0xf]  ;;  %v4084_v1 = vld [vmem:[#allocation7 + $0xc8] sm:$0xf0] }
 0x106   :  { %2063 = vmatpush.bf16.msrb.mxu1 %v3679_v22  ;;  %2076 = vmatpush.bf16.msrb.mxu2 %v3807_v9  ;;  %v3487_v22 = vor.u32 %v4491_v60, %v3484_v63  ;;  %v4106_v9 = vld [vmem:[#allocation7 + $0xf0] sm:$0xf]  ;;  %v1810_v17 = vadd.f32 %v5002_v13, %v1797_v20  ;;  %v4066_v60 = vld [vmem:[#allocation7 + $0xa0] sm:$0xf]  ;;  %v4637_v20 = vld [vmem:[#allocation7 + $0x94] sm:$0xf0] }
 0x107   :  { %2089 = vmatpush.bf16.msrb.mxu3 %v3935_v14  ;;  %v1837_v6 = vpop.f32.mrf.mxu3  ;;  %v3871_v14 = vor.u32 %v4587_v5, %v3868_v7  ;;  %v4107_v16 = vor.u32 %v4649_v10, %v4106_v9  ;;  %v4090_v13 = vld [vmem:[#allocation7 + $0xd0] sm:$0xf]  ;;  %v4621_v7 = vld [vmem:[#allocation7 + $0x14] sm:$0xf0]  ;;  %v4659_v9 = vld [vmem:[#allocation7 + $0x144] sm:$0xf0] }
 0x108   :  { %2051 = vmatpush.bf16.msrb.mxu0 %v3535_v25  ;;  %v4098_v25 = vld [vmem:[#allocation7 + $0xe0] sm:$0xf]  ;;  %v1823_v29 = vadd.f32 %v5004_v32, %v1810_v17  ;;  %v4643_v32 = vld [vmem:[#allocation7 + $0xc4] sm:$0xf0]  ;;  %v3994_v6 = vld [vmem:[#allocation7 + $0x10] sm:$0xf] }
 0x109   :  { %v4050_v17 = vld [vmem:[#allocation7 + $0x80] sm:$0xf] }
 0x10a   :  { %2064 = vmatpush.bf16.msrb.mxu1 %v3663_v27  ;;  %2077 = vmatpush.bf16.msrb.mxu2 %v3791_v28  ;;  %v4647_v27 = vld [vmem:[#allocation7 + $0xe4] sm:$0xf0]  ;;  %v1836_v35 = vadd.f32 %v5006_v37, %v1823_v29  ;;  %v4641_v37 = vld [vmem:[#allocation7 + $0xb4] sm:$0xf0] }
 0x10b   :  { %2090 = vmatpush.bf16.msrb.mxu3 %v3919_v33  ;;  %v4099_v28 = vor.u32 %v4647_v27, %v4098_v25  ;;  %v4645_v33 = vld [vmem:[#allocation7 + $0xd4] sm:$0xf0]  ;;  %v4075_v57 = vor.u32 %v4641_v37, %v4074_v48  ;;  %v4044_v27 = vld [vmem:[#allocation7 + $0x78] sm:$0xf0] }
 0x10c   :  { %2052 = vmatpush.bf16.msrb.mxu0 %v3519_v24  ;;  %v4091_v36 = vor.u32 %v4645_v33, %v4090_v13  ;;  %v4170_v24 = vld [vmem:[#allocation7 + $0x170] sm:$0xf]  ;;  %v4657_v29 = vld [vmem:[#allocation7 + $0x134] sm:$0xf0]  ;;  %v4028_v37 = vld [vmem:[#allocation7 + $0x58] sm:$0xf0] }
 0x10d   :  { %v4653_v48 = vld [vmem:[#allocation7 + $0x114] sm:$0xf0] }
 0x10e   :  { %2065 = vmatpush.bf16.msrb.mxu1 %v3647_v45  ;;  %2078 = vmatpush.bf16.msrb.mxu2 %v3775_v46  ;;  %v4171_v45 = vor.u32 %v4665_v43, %v4170_v24  ;;  %v4083_v46 = vor.u32 %v4643_v32, %v4082_v40  ;;  %v4111_v40 = vor.u32 %v4648_v30, %v4108_v31  ;;  %v4036_v32 = vld [vmem:[#allocation7 + $0x68] sm:$0xf0]  ;;  %v4130_v24 = vld [vmem:[#allocation7 + $0x120] sm:$0xf]  ;;  %v4655_v43 = vld [vmem:[#allocation7 + $0x124] sm:$0xf0] }
 0x10f   :  { %2091 = vmatpush.bf16.msrb.mxu3 %v3903_v51  ;;  %v4162_v51 = vld [vmem:[#allocation7 + $0x160] sm:$0xf]  ;;  %v3996_v30 = vld [vmem:[#allocation7 + $0x18] sm:$0xf0]  ;;  %v4636_v31 = vld [vmem:[#allocation7 + $0x94] sm:$0xf] }
 0x110   :  { %2053 = vmatpush.bf16.msrb.mxu0 %v3503_v59  ;;  %v4163_v54 = vor.u32 %v4663_v53, %v4162_v51  ;;  %v4623_v59 = vld [vmem:[#allocation7 + $0x24] sm:$0xf0]  ;;  %v4644_v51 = vld [vmem:[#allocation7 + $0xd4] sm:$0xf] }
 0x112   :  { %2066 = vmatpush.bf16.msrb.mxu1 %v3631_v61  ;;  %2079 = vmatpush.bf16.msrb.mxu2 %v3759_v62  ;;  %v4639_v62 = vld [vmem:[#allocation7 + $0xa4] sm:$0xf0] }
 0x113   :  { %2092 = vmatpush.bf16.msrb.mxu3 %v3887_v18  ;;  %v4003_v18 = vor.u32 %v4623_v59, %v4002_v58  ;;  %v4067_v5 = vor.u32 %v4639_v62, %v4066_v60  ;;  %v4172_v58 = vld [vmem:[#allocation7 + $0x178] sm:$0xf0]  ;;  %v4020_v62 = vld [vmem:[#allocation7 + $0x48] sm:$0xf0] }
 0x114   :  { %2054 = vmatpush.bf16.msrb.mxu0 %v3487_v22  ;;  %v4146_v22 = vld [vmem:[#allocation7 + $0x140] sm:$0xf] }
 0x115   :  { %v4147_v10 = vor.u32 %v4659_v9, %v4146_v22  ;;  %v4164_v22 = vld [vmem:[#allocation7 + $0x168] sm:$0xf0] }
 0x116   :  { %2067 = vmatpush.bf16.msrb.mxu1 %v3615_v11  ;;  %2080 = vmatpush.bf16.msrb.mxu2 %v3743_v12  ;;  %v1861_v50 = vpop.f32.mrf.mxu1  ;;  %v3995_v12 = vor.u32 %v4621_v7, %v3994_v6  ;;  %v4640_v6 = vld [vmem:[#allocation7 + $0xb4] sm:$0xf] }
 0x117   :  { %2093 = vmatpush.bf16.msrb.mxu3 %v3871_v14  ;;  %2055 = vmatmul.bf16.vlgmr.msrb.gmra.mxu0 %v4959_v41  ;;  %v4018_v41 = vld [vmem:[#allocation7 + $0x40] sm:$0xf] }
 0x118   :  { %2497 = vmatpush.bf16.msra.mxu0 %v4043_v15  ;;  %v3986_v14 = vld [vmem:[#allocation7] sm:$0xf]  ;;  %v4619_v15 = vld [vmem:[#allocation7 + $0x4] sm:$0xf0] }
 0x119   :  { %2068 = vmatmul.bf16.vlgmr.msrb.gmra.mxu1 %v4963_v44  ;;  %2081 = vmatmul.bf16.vlgmr.msrb.gmra.mxu2 %v4957_v38  ;;  %v4019_v44 = vor.u32 %v4627_v39, %v4018_v41  ;;  %v1848_v38 = vpop.f32.mrf.mxu0  ;;  %v4047_v41 = vor.u32 %v4632_v23, %v4044_v27  ;;  %v4630_v39 = vld [vmem:[#allocation7 + $0x64] sm:$0xf]  ;;  %v4156_v23 = vld [vmem:[#allocation7 + $0x158] sm:$0xf0] }
 0x11a   :  { %2510 = vmatpush.bf16.msra.mxu1 %v4107_v16  ;;  %2094 = vmatmul.bf16.vlgmr.msrb.gmra.mxu3 %v4961_v42  ;;  %v4625_v42 = vld [vmem:[#allocation7 + $0x34] sm:$0xf0]  ;;  %v1849_v49 = vadd.f32 %v1848_v38, %v1836_v35  ;;  %v4059_v16 = vor.u32 %v4637_v20, %v4058_v19  ;;  %v2099_v35 = vmax.f32 %v4994_v52, 0.0  ;;  %v4131_v38 = vor.u32 %v4655_v43, %v4130_v24  ;;  %v4076_v19 = vld [vmem:[#allocation7 + $0xb8] sm:$0xf0] }
 0x11b   :  { %2523 = vmatpush.bf16.msra.mxu2 %v4171_v45  ;;  %v4011_v55 = vor.u32 %v4625_v42, %v4010_v47  ;;  %v4646_v45 = vld [vmem:[#allocation7 + $0xe4] sm:$0xf]  ;;  %v4039_v52 = vor.u32 %v4630_v39, %v4036_v32  ;;  %v4122_v42 = vld [vmem:[#allocation7 + $0x110] sm:$0xf] }
 0x11c   :  { %2498 = vmatpush.bf16.msra.mxu0 %v4035_v8  ;;  %v1862_v56 = vadd.f32 %v1861_v50, %v1849_v49  ;;  %v1874_v61 = vpop.f32.mrf.mxu2  ;;  %v5020_v47 = vpack.c.bf16 %v2099_v35, %v2099_v35  ;;  %v4628_v50 = vld [vmem:[#allocation7 + $0x54] sm:$0xf]  ;;  %v4123_v53 = vor.u32 %v4653_v48, %v4122_v42  ;;  %v4662_v20 = vld [vmem:[#allocation7 + $0x164] sm:$0xf]  ;;  %v4052_v42 = vld [vmem:[#allocation7 + $0x88] sm:$0xf0] }
 0x11d   :  { %v4031_v59 = vor.u32 %v4628_v50, %v4028_v37  ;;  %v4167_v9 = vor.u32 %v4662_v20, %v4164_v22  ;;  %v4658_v35 = vld [vmem:[#allocation7 + $0x144] sm:$0xf] }
 0x11e   :  { %2511 = vmatpush.bf16.msra.mxu1 %v4099_v28  ;;  %v1875_v3 = vadd.f32 %v1874_v61, %v1862_v56  ;;  %v1863_v26 = vpop.f32.mrf.mxu1  ;;  %v4138_v28 = vld [vmem:[#allocation7 + $0x130] sm:$0xf]  ;;  %v4651_v56 = vld [vmem:[#allocation7 + $0x104] sm:$0xf0]  ;;  %v4626_v61 = vld [vmem:[#allocation7 + $0x44] sm:$0xf] }
 0x11f   :  { %2524 = vmatpush.bf16.msra.mxu2 %v4163_v54  ;;  %v1887_v63 = vpop.f32.mrf.mxu3  ;;  %v4139_v13 = vor.u32 %v4657_v29, %v4138_v28  ;;  %v4092_v54 = vld [vmem:[#allocation7 + $0xd8] sm:$0xf0]  ;;  %v4620_v29 = vld [vmem:[#allocation7 + $0x14] sm:$0xf]  ;;  %v4618_v24 = vld [vmem:[#allocation7 + $0x4] sm:$0xf] }
 0x120   :  { %2499 = vmatpush.bf16.msra.mxu0 %v4027_v34  ;;  %v1888_v11 = vadd.f32 %v1887_v63, %v1875_v3  ;;  %v3987_v34 = vor.u32 %v4619_v15, %v3986_v14  ;;  %v4095_v60 = vor.u32 %v4644_v51, %v4092_v54  ;;  %v4087_v3 = vor.u32 %v4642_v0, %v4084_v1  ;;  %v4004_v14 = vld [vmem:[#allocation7 + $0x28] sm:$0xf0]  ;;  %v4638_v15 = vld [vmem:[#allocation7 + $0xa4] sm:$0xf] }
 0x121   :  { %v1850_v4 = vpop.f32.mrf.mxu0  ;;  %v3999_v39 = vor.u32 %v4620_v29, %v3996_v30  ;;  %v4654_v37 = vld [vmem:[#allocation7 + $0x124] sm:$0xf]  ;;  %v4132_v51 = vld [vmem:[#allocation7 + $0x128] sm:$0xf0]  ;;  %v4671_v29 = vld [vmem:[#allocation7 + $0x1a4] sm:$0xf0] }
 0x122   :  { %2512 = vmatpush.bf16.msra.mxu1 %v4091_v36  ;;  %v2100_v33 = vmax.f32 %v1888_v11, 0.0  ;;  %v4051_v36 = vor.u32 %v4635_v21, %v4050_v17  ;;  %v4624_v4 = vld [vmem:[#allocation7 + $0x34] sm:$0xf]  ;;  %v4079_v11 = vor.u32 %v4640_v6, %v4076_v19  ;;  %v4650_v0 = vld [vmem:[#allocation7 + $0x104] sm:$0xf] }
 0x123   :  { %2525 = vmatpush.bf16.msra.mxu2 %v4155_v2  ;;  %v4660_v21 = vld [vmem:[#allocation7 + $0x154] sm:$0xf]  ;;  %v4116_v1 = vld [vmem:[#allocation7 + $0x108] sm:$0xf0]  ;;  %v4677_v19 = vld [vmem:[#allocation7 + $0x1d4] sm:$0xf0] }
 0x124   :  { %2500 = vmatpush.bf16.msra.mxu0 %v4019_v44  ;;  %v1876_v25 = vpop.f32.mrf.mxu2  ;;  %v4100_v44 = vld [vmem:[#allocation7 + $0xe8] sm:$0xf0]  ;;  %v4159_v27 = vor.u32 %v4660_v21, %v4156_v23 }
 0x125   :  { %v4103_v49 = vor.u32 %v4646_v45, %v4100_v44  ;;  %v3988_v45 = vld [vmem:[#allocation7 + $0x8] sm:$0xf0]  ;;  %v4656_v44 = vld [vmem:[#allocation7 + $0x134] sm:$0xf] }
 0x126   :  { %2513 = vmatpush.bf16.msra.mxu1 %v4083_v46  ;;  %v5018_v46 = vpack.c.bf16 %v2100_v33, %v2100_v33  ;;  %v4060_v33 = vld [vmem:[#allocation7 + $0x98] sm:$0xf0] }
 0x127   :  { %2526 = vmatpush.bf16.msra.mxu2 %v4147_v10  ;;  %v1889_v8 = vpop.f32.mrf.mxu3  ;;  %v4063_v43 = vor.u32 %v4636_v31, %v4060_v33 }
 0x128   :  { %2501 = vmatpush.bf16.msra.mxu0 %v4011_v55  ;;  %v4114_v55 = vld [vmem:[#allocation7 + $0x100] sm:$0xf] }
 0x129   :  { %v4115_v63 = vor.u32 %v4651_v56, %v4114_v55  ;;  %v3991_v55 = vor.u32 %v4618_v24, %v3988_v45  ;;  %v4681_v56 = vld [vmem:[#allocation7 + $0x1f4] sm:$0xf0]  ;;  %v4680_v24 = vld [vmem:[#allocation7 + $0x1f4] sm:$0xf] }
 0x12a   :  { %2514 = vmatpush.bf16.msra.mxu1 %v4075_v57  ;;  %v4664_v57 = vld [vmem:[#allocation7 + $0x174] sm:$0xf] }
 0x12b   :  { %2527 = vmatpush.bf16.msra.mxu2 %v4139_v13  ;;  %v4175_v2 = vor.u32 %v4664_v57, %v4172_v58 }
 0x12c   :  { %2502 = vmatpush.bf16.msra.mxu0 %v4003_v18  ;;  %v4023_v18 = vor.u32 %v4626_v61, %v4020_v62  ;;  %v4124_v61 = vld [vmem:[#allocation7 + $0x118] sm:$0xf0] }
 0x12e   :  { %2515 = vmatpush.bf16.msra.mxu1 %v4067_v5  ;;  %v4012_v5 = vld [vmem:[#allocation7 + $0x38] sm:$0xf0] }
 0x12f   :  { %2528 = vmatpush.bf16.msra.mxu2 %v4131_v38  ;;  %v4015_v10 = vor.u32 %v4624_v4, %v4012_v5  ;;  %v4140_v38 = vld [vmem:[#allocation7 + $0x138] sm:$0xf0]  ;;  %v4226_v4 = vld [vmem:[#allocation7 + $0x1e0] sm:$0xf]  ;;  %v4679_v5 = vld [vmem:[#allocation7 + $0x1e4] sm:$0xf0] }
 0x130   :  { %2503 = vmatpush.bf16.msra.mxu0 %v3995_v12  ;;  %v4622_v12 = vld [vmem:[#allocation7 + $0x24] sm:$0xf]  ;;  %v4227_v6 = vor.u32 %v4679_v5, %v4226_v4  ;;  %v4188_v4 = vld [vmem:[#allocation7 + $0x198] sm:$0xf0] }
 0x131   :  { %v4007_v8 = vor.u32 %v4622_v12, %v4004_v14 }
 0x132   :  { %2516 = vmatpush.bf16.msra.mxu1 %v4059_v16  ;;  %v4068_v16 = vld [vmem:[#allocation7 + $0xa8] sm:$0xf0] }
 0x133   :  { %2529 = vmatpush.bf16.msra.mxu2 %v4123_v53  ;;  %v4071_v28 = vor.u32 %v4638_v15, %v4068_v16  ;;  %v4234_v53 = vld [vmem:[#allocation7 + $0x1f0] sm:$0xf] }
 0x134   :  { %2504 = vmatpush.bf16.msra.mxu0 %v3987_v34  ;;  %v1900_v7 = vpop.f32.mrf.mxu0  ;;  %v4235_v58 = vor.u32 %v4681_v56, %v4234_v53  ;;  %v4202_v16 = vld [vmem:[#allocation7 + $0x1b0] sm:$0xf] }
 0x136   :  { %2517 = vmatpush.bf16.msra.mxu1 %v4051_v36  ;;  %v5024_v26 = vpop.f32.mrf.mxu1  ;;  %v4148_v36 = vld [vmem:[#allocation7 + $0x148] sm:$0xf0]  ;;  %2536 = vmatpush.bf16.msra.mxu3 %v4235_v58 }
 0x137   :  { %2505 = vmatmul.bf16.vlgmr.msra.gmra.mxu0 %v5020_v47  ;;  %2530 = vmatpush.bf16.msra.mxu2 %v4115_v63 }
 0x138   :  { %2549 = vmatpush.bf16.msrb.mxu0 %v4047_v41  ;;  %v4151_v41 = vor.u32 %v4658_v35, %v4148_v36  ;;  %v4669_v35 = vld [vmem:[#allocation7 + $0x194] sm:$0xf0] }
 0x139   :  { %2518 = vmatmul.bf16.vlgmr.msra.gmra.mxu1 %v5018_v46 }
 0x13a   :  { %2562 = vmatpush.bf16.msrb.mxu1 %v4111_v40  ;;  %v5029_v40 = vld [vmem:[%s5143_s2] sm:$0xf]  ;;  %2537 = vmatpush.bf16.msra.mxu3 %v4227_v6 }
 0x13b   :  { %2575 = vmatpush.bf16.msrb.mxu2 %v4175_v2  ;;  %v369_v32 = vperm.slane %v5029_v40, 2 }
 0x13c   :  { %2550 = vmatpush.bf16.msrb.mxu0 %v4039_v52  ;;  %v1926_v17 = vpop.f32.mrf.mxu2  ;;  %v1902_v13 = vpop.f32.mrf.mxu0  ;;  %v4634_v52 = vld [vmem:[#allocation7 + $0x84] sm:$0xf] }
 0x13d   :  { %v1901_v54 = vadd.f32 %v1900_v7, %v369_v32  ;;  %v4055_v57 = vor.u32 %v4634_v52, %v4052_v42  ;;  %v4218_v7 = vld [vmem:[#allocation7 + $0x1d0] sm:$0xf] }
 0x13e   :  { %2563 = vmatpush.bf16.msrb.mxu1 %v4103_v49  ;;  %v1915_v34 = vpop.f32.mrf.mxu1  ;;  %v4143_v49 = vor.u32 %v4656_v44, %v4140_v38  ;;  %v4678_v44 = vld [vmem:[#allocation7 + $0x1e4] sm:$0xf]  ;;  %v4228_v38 = vld [vmem:[#allocation7 + $0x1e8] sm:$0xf0] }
 0x13f   :  { %2576 = vmatpush.bf16.msrb.mxu2 %v4167_v9  ;;  %v1939_v25 = vpop.f32.mrf.mxu3  ;;  %v1914_v62 = vadd.f32 %v5024_v26, %v1901_v54  ;;  %v4219_v9 = vor.u32 %v4677_v19, %v4218_v7  ;;  %v4186_v34 = vld [vmem:[#allocation7 + $0x190] sm:$0xf]  ;;  %v4231_v42 = vor.u32 %v4678_v44, %v4228_v38  ;;  %v4674_v54 = vld [vmem:[#allocation7 + $0x1c4] sm:$0xf]  ;;  %v4180_v19 = vld [vmem:[#allocation7 + $0x188] sm:$0xf0] }
 0x140   :  { %2551 = vmatpush.bf16.msrb.mxu0 %v4031_v59  ;;  %v4135_v59 = vor.u32 %v4654_v37, %v4132_v51  ;;  %v4187_v36 = vor.u32 %v4669_v35, %v4186_v34  ;;  %v4666_v7 = vld [vmem:[#allocation7 + $0x184] sm:$0xf]  ;;  %v4697_v44 = vld [vmem:[%s5146_s5 + $0x78] sm:$0xff]  ;;  %v4688_v38 = vld [vmem:[%s5146_s5 + $0x30] sm:$0xff] }
 0x141   :  { %v1927_v2 = vadd.f32 %v1926_v17, %v1914_v62  ;;  %2538 = vmatpush.bf16.msra.mxu3 %v4219_v9  ;;  %v4673_v17 = vld [vmem:[#allocation7 + $0x1b4] sm:$0xf0] }
 0x142   :  { %2564 = vmatpush.bf16.msrb.mxu1 %v4095_v60  ;;  %v4652_v60 = vld [vmem:[#allocation7 + $0x114] sm:$0xf] }
 0x143   :  { %2577 = vmatpush.bf16.msrb.mxu2 %v4159_v27  ;;  %v4127_v63 = vor.u32 %v4652_v60, %v4124_v61  ;;  %v4203_v27 = vor.u32 %v4673_v17, %v4202_v16  ;;  %v4204_v60 = vld [vmem:[#allocation7 + $0x1b8] sm:$0xf0]  ;;  %v370_v61 = vperm.slane %v5029_v40, 3 }
 0x144   :  { %2552 = vmatpush.bf16.msrb.mxu0 %v4023_v18  ;;  %v1928_v48 = vpop.f32.mrf.mxu2  ;;  %v4119_v18 = vor.u32 %v4650_v0, %v4116_v1  ;;  %v4196_v0 = vld [vmem:[#allocation7 + $0x1a8] sm:$0xf0] }
 0x146   :  { %2565 = vmatpush.bf16.msrb.mxu1 %v4087_v3  ;;  %v1940_v3 = vadd.f32 %v1939_v25, %v1927_v2 }
 0x147   :  { %2578 = vmatpush.bf16.msrb.mxu2 %v4151_v41  ;;  %v1941_v50 = vpop.f32.mrf.mxu3  ;;  %v4178_v41 = vld [vmem:[#allocation7 + $0x180] sm:$0xf] }
 0x148   :  { %2553 = vmatpush.bf16.msrb.mxu0 %v4015_v10  ;;  %v4210_v10 = vld [vmem:[#allocation7 + $0x1c0] sm:$0xf]  ;;  %v4220_v50 = vld [vmem:[#allocation7 + $0x1d8] sm:$0xf0] }
 0x14a   :  { %2566 = vmatpush.bf16.msrb.mxu1 %v4079_v11  ;;  %v4675_v11 = vld [vmem:[#allocation7 + $0x1c4] sm:$0xf0] }
 0x14b   :  { %2579 = vmatpush.bf16.msrb.mxu2 %v4143_v49  ;;  %v4676_v49 = vld [vmem:[#allocation7 + $0x1d4] sm:$0xf] }
 0x14c   :  { %2554 = vmatpush.bf16.msrb.mxu0 %v4007_v8  ;;  %v4223_v37 = vor.u32 %v4676_v49, %v4220_v50  ;;  %v4686_v49 = vld [vmem:[%s5146_s5 + $0x20] sm:$0xff]  ;;  %v4685_v50 = vld [vmem:[%s5146_s5 + $0x18] sm:$0xff] }
 0x14e   :  { %2567 = vmatpush.bf16.msrb.mxu1 %v4071_v28  ;;  %v4194_v28 = vld [vmem:[#allocation7 + $0x1a0] sm:$0xf] }
 0x14f   :  { %2580 = vmatpush.bf16.msrb.mxu2 %v4135_v59  ;;  %v4195_v13 = vor.u32 %v4671_v29, %v4194_v28  ;;  %v4672_v59 = vld [vmem:[#allocation7 + $0x1b4] sm:$0xf] }
 0x150   :  { %2555 = vmatpush.bf16.msrb.mxu0 %v3999_v39  ;;  %v4667_v39 = vld [vmem:[#allocation7 + $0x184] sm:$0xf0]  ;;  %v4207_v62 = vor.u32 %v4672_v59, %v4204_v60  ;;  %v4693_v59 = vld [vmem:[%s5146_s5 + $0x58] sm:$0xff]  ;;  %v4692_v60 = vld [vmem:[%s5146_s5 + $0x50] sm:$0xff] }
 0x151   :  { %v4179_v32 = vor.u32 %v4667_v39, %v4178_v41 }
 0x152   :  { %2568 = vmatpush.bf16.msrb.mxu1 %v4063_v43  ;;  %v4236_v43 = vld [vmem:[#allocation7 + $0x1f8] sm:$0xf0] }
 0x153   :  { %2581 = vmatpush.bf16.msrb.mxu2 %v4127_v63  ;;  %v4239_v45 = vor.u32 %v4680_v24, %v4236_v43  ;;  %v4670_v63 = vld [vmem:[#allocation7 + $0x1a4] sm:$0xf] }
 0x154   :  { %2556 = vmatpush.bf16.msrb.mxu0 %v3991_v55  ;;  %v1952_v26 = vpop.f32.mrf.mxu0  ;;  %v4212_v55 = vld [vmem:[#allocation7 + $0x1c8] sm:$0xf0] }
 0x155   :  { %v1953_v20 = vadd.f32 %v1952_v26, %v1940_v3  ;;  %v4668_v3 = vld [vmem:[#allocation7 + $0x194] sm:$0xf] }
 0x156   :  { %2569 = vmatpush.bf16.msrb.mxu1 %v4055_v57  ;;  %v1965_v22 = vpop.f32.mrf.mxu1  ;;  %v4215_v57 = vor.u32 %v4674_v54, %v4212_v55  ;;  %v4191_v6 = vor.u32 %v4668_v3, %v4188_v4  ;;  %v4683_v55 = vld [vmem:[%s5146_s5 + $0x8] sm:$0xff] }
 0x157   :  { %2557 = vmatmul.bf16.vlgmr.msrb.gmra.mxu0 %v5020_v47  ;;  %2582 = vmatpush.bf16.msrb.mxu2 %v4119_v18  ;;  %v1966_v47 = vadd.f32 %v1965_v22, %v1953_v20  ;;  %v4199_v18 = vor.u32 %v4670_v63, %v4196_v0  ;;  %v4183_v20 = vor.u32 %v4666_v7, %v4180_v19  ;;  %v4705_v63 = vld [vmem:[%s5148_s7 + $0x38] sm:$0xff]  ;;  %v4704_v0 = vld [vmem:[%s5148_s7 + $0x30] sm:$0xff] }
 0x159   :  { %2570 = vmatmul.bf16.vlgmr.msrb.gmra.mxu1 %v5018_v46  ;;  %v4211_v46 = vor.u32 %v4675_v11, %v4210_v10 }
 0x15a   :  { %2750 = vmatpush.bf16.msra.mxu1 %v4697_v44 }
 0x15b   :  { %2539 = vmatpush.bf16.msra.mxu3 %v4211_v46 }
 0x15c   :  { %v1978_v12 = vpop.f32.mrf.mxu2  ;;  %v1954_v23 = vpop.f32.mrf.mxu0 }
 0x15d   :  { %v1979_v14 = vadd.f32 %v1978_v12, %v1966_v47 }
 0x15e   :  { %v1967_v25 = vpop.f32.mrf.mxu1 }
 0x15f   :  { %v1991_v15 = vpop.f32.mrf.mxu3  ;;  %2540 = vmatpush.bf16.msra.mxu3 %v4203_v27 }
 0x160   :  { %v1992_v21 = vadd.f32 %v1991_v15, %v1979_v14 }
 0x162   :  { %v2101_v8 = vmax.f32 %v1992_v21, 0.0 }
 0x163   :  { %2541 = vmatpush.bf16.msra.mxu3 %v4195_v13 }
 0x164   :  { %v2105_v30 = vpack.c.bf16 %v2101_v8, %v2101_v8  ;;  %v1980_v31 = vpop.f32.mrf.mxu2  ;;  %v2171_v8 = vld [vmem:[#allocation8] sm:$0x3] }
 0x165   :  { %v2173_v28 = vperm.slane %v2171_v8, 0  ;;  %v2174_v35 = vperm.slane %v2171_v8, 1 }
 0x166   :  { %2531 = vmatmul.bf16.vlgmr.msra.gmra.mxu2 %v2105_v30 }
 0x167   :  { %v1993_v33 = vpop.f32.mrf.mxu3  ;;  %2542 = vmatpush.bf16.msra.mxu3 %v4187_v36  ;;  %2833 = vmatpush.bf16.msra.mxu2 %v4705_v63 }
 0x16b   :  { %2543 = vmatpush.bf16.msra.mxu3 %v4179_v32  ;;  %2834 = vmatpush.bf16.msra.mxu2 %v4704_v0 }
 0x16f   :  { %2588 = vmatpush.bf16.msrb.mxu3 %v4239_v45  ;;  %v4689_v45 = vld [vmem:[%s5146_s5 + $0x38] sm:$0xff] }
 0x170   :  { %2737 = vmatpush.bf16.msra.mxu0 %v4689_v45 }
 0x173   :  { %2589 = vmatpush.bf16.msrb.mxu3 %v4231_v42  ;;  %v4687_v42 = vld [vmem:[%s5146_s5 + $0x28] sm:$0xff] }
 0x174   :  { %v2004_v52 = vpop.f32.mrf.mxu0  ;;  %2738 = vmatpush.bf16.msra.mxu0 %v4688_v38 }
 0x175   :  { %v2005_v5 = vadd.f32 %v2004_v52, %v370_v61  ;;  %v4696_v52 = vld [vmem:[%s5146_s5 + $0x70] sm:$0xff]  ;;  %v4691_v61 = vld [vmem:[%s5146_s5 + $0x48] sm:$0xff] }
 0x176   :  { %2583 = vmatmul.bf16.vlgmr.msrb.gmra.mxu2 %v2105_v30  ;;  %v2017_v48 = vpop.f32.mrf.mxu1  ;;  %2751 = vmatpush.bf16.msra.mxu1 %v4696_v52  ;;  %v4724_v52 = vld [vmem:[%s5153_s12] ss:$0 sm:$0xff] }
 0x177   :  { %2590 = vmatpush.bf16.msrb.mxu3 %v4223_v37  ;;  %v2018_v26 = vadd.f32 %v2017_v48, %v2005_v5 }
 0x178   :  { %2739 = vmatpush.bf16.msra.mxu0 %v4687_v42 }
 0x17b   :  { %2591 = vmatpush.bf16.msrb.mxu3 %v4215_v57  ;;  %v4682_v57 = vld [vmem:[%s5146_s5] sm:$0xff] }
 0x17c   :  { %v2030_v51 = vpop.f32.mrf.mxu2  ;;  %v2006_v56 = vpop.f32.mrf.mxu0  ;;  %2740 = vmatpush.bf16.msra.mxu0 %v4686_v49 }
 0x17d   :  { %v2031_v22 = vadd.f32 %v2030_v51, %v2018_v26  ;;  %v4684_v51 = vld [vmem:[%s5146_s5 + $0x10] sm:$0xff]  ;;  %v4695_v56 = vld [vmem:[%s5146_s5 + $0x68] sm:$0xff] }
 0x17e   :  { %v2019_v58 = vpop.f32.mrf.mxu1  ;;  %2752 = vmatpush.bf16.msra.mxu1 %v4695_v56 }
 0x17f   :  { %v2043_v53 = vpop.f32.mrf.mxu3  ;;  %2592 = vmatpush.bf16.msrb.mxu3 %v4207_v62  ;;  %v4694_v58 = vld [vmem:[%s5146_s5 + $0x60] sm:$0xff] }
 0x180   :  { %v2044_v40 = vadd.f32 %v2043_v53, %v2031_v22  ;;  %2741 = vmatpush.bf16.msra.mxu0 %v4685_v50  ;;  %v4690_v62 = vld [vmem:[%s5146_s5 + $0x40] sm:$0xff] }
 0x182   :  { %2753 = vmatpush.bf16.msra.mxu1 %v4694_v58 }
 0x183   :  { %2593 = vmatpush.bf16.msrb.mxu3 %v4199_v18 }
 0x184   :  { %v2032_v1 = vpop.f32.mrf.mxu2  ;;  %2742 = vmatpush.bf16.msra.mxu0 %v4684_v51 }
 0x186   :  { %2754 = vmatpush.bf16.msra.mxu1 %v4693_v59 }
 0x187   :  { %v2045_v2 = vpop.f32.mrf.mxu3  ;;  %2594 = vmatpush.bf16.msrb.mxu3 %v4191_v6 }
 0x188   :  { %2743 = vmatpush.bf16.msra.mxu0 %v4683_v55 }
 0x18a   :  { %2755 = vmatpush.bf16.msra.mxu1 %v4692_v60 }
 0x18b   :  { %2595 = vmatpush.bf16.msrb.mxu3 %v4183_v20 }
 0x18c   :  { %2744 = vmatpush.bf16.msra.mxu0 %v4682_v57 }
 0x18e   :  { %2756 = vmatpush.bf16.msra.mxu1 %v4691_v61 }
 0x192   :  { %2757 = vmatpush.bf16.msra.mxu1 %v4690_v62 }
 0x194   :  { %v2056_v9 = vpop.f32.mrf.mxu0 }
 0x195   :  { %v2057_v10 = vadd.f32 %v2056_v9, %v2044_v40  ;;  %v4703_v40 = vld [vmem:[%s5148_s7 + $0x28] sm:$0xff]  ;;  %v4702_v9 = vld [vmem:[%s5148_s7 + $0x20] sm:$0xff] }
 0x196   :  { %v2069_v47 = vpop.f32.mrf.mxu1  ;;  %2835 = vmatpush.bf16.msra.mxu2 %v4703_v40 }
 0x197   :  { %v2070_v11 = vadd.f32 %v2069_v47, %v2057_v10  ;;  %v4701_v47 = vld [vmem:[%s5148_s7 + $0x18] sm:$0xff]  ;;  %v4700_v10 = vld [vmem:[%s5148_s7 + $0x10] sm:$0xff] }
 0x19a   :  { %2836 = vmatpush.bf16.msra.mxu2 %v4702_v9 }
 0x19c   :  { %v2082_v12 = vpop.f32.mrf.mxu2  ;;  %v2058_v15 = vpop.f32.mrf.mxu0 }
 0x19d   :  { %v2083_v46 = vadd.f32 %v2082_v12, %v2070_v11  ;;  %v2095_v14 = vpop.f32.mrf.mxu3  ;;  %v4699_v11 = vld [vmem:[%s5148_s7 + $0x8] sm:$0xff]  ;;  %v4698_v12 = vld [vmem:[%s5148_s7] sm:$0xff] }
 0x19e   :  { %v2071_v16 = vpop.f32.mrf.mxu1  ;;  %2837 = vmatpush.bf16.msra.mxu2 %v4701_v47  ;;  %v4707_v15 = vld [vmem:[%s5150_s9 + $0x8] sm:$0xff] }
 0x19f   :  { %v2096_v17 = vadd.f32 %v2095_v14, %v2083_v46  ;;  %v4709_v46 = vld [vmem:[%s5150_s9 + $0x18] sm:$0xff]  ;;  %v4708_v14 = vld [vmem:[%s5150_s9 + $0x10] sm:$0xff] }
 0x1a1   :  { %v2102_v21 = vmax.f32 %v2096_v17, 0.0 }
 0x1a2   :  { %2838 = vmatpush.bf16.msra.mxu2 %v4700_v10 }
 0x1a3   :  { %v2106_v23 = vpack.c.bf16 %v2102_v21, %v2102_v21  ;;  %v4721_v21 = vld [vmem:[%s5147_s6] ss:$0 sm:$0xff] }
 0x1a4   :  { %v2084_v25 = vpop.f32.mrf.mxu2 }
 0x1a5   :  { %v2097_v27 = vpop.f32.mrf.mxu3  ;;  %2544 = vmatmul.bf16.vlgmr.msra.gmra.mxu3 %v2106_v23 }
 0x1a6   :  { %2839 = vmatpush.bf16.msra.mxu2 %v4699_v11  ;;  %2892 = vmatpush.bf16.msra.mxu3 %v4709_v46 }
 0x1aa   :  { %2840 = vmatpush.bf16.msra.mxu2 %v4698_v12  ;;  %2893 = vmatpush.bf16.msra.mxu3 %v4708_v14 }
 0x1ae   :  { %2894 = vmatpush.bf16.msra.mxu3 %v4707_v15 }
 0x1b4   :  { %v2506_v29 = vpop.f32.mrf.mxu0 }
 0x1b5   :  { %v2507_v30 = vadd.f32 %v2506_v29, %v2173_v28  ;;  %2596 = vmatmul.bf16.vlgmr.msrb.gmra.mxu3 %v2106_v23 }
 0x1b6   :  { %v2519_v31 = vpop.f32.mrf.mxu1 }
 0x1b7   :  { %v2520_v13 = vadd.f32 %v2519_v31, %v2507_v30  ;;  %v4706_v30 = vld [vmem:[%s5150_s9] sm:$0xff]  ;;  %v4711_v31 = vld [vmem:[%s5152_s11 + $0x8] sm:$0xff] }
 0x1b8   :  { %2895 = vmatpush.bf16.msra.mxu3 %v4706_v30 }
 0x1bc   :  { %v2508_v33 = vpop.f32.mrf.mxu0  ;;  %2933 = vmatpush.bf16.msrb.mxu3 %v4711_v31 }
 0x1bd   :  { %v4722_v33 = vld [vmem:[%s5149_s8] ss:$0 sm:$0xff] }
 0x1be   :  { %v2521_v34 = vpop.f32.mrf.mxu1 }
 0x1d4   :  { %v2558_v36 = vpop.f32.mrf.mxu0 }
 0x1d5   :  { %v2559_v41 = vadd.f32 %v2558_v36, %v2174_v35 }
 0x1d6   :  { %v2571_v39 = vpop.f32.mrf.mxu1 }
 0x1d7   :  { %v2572_v32 = vadd.f32 %v2571_v39, %v2559_v41 }
 0x1dc   :  { %v2560_v24 = vpop.f32.mrf.mxu0 }
 0x1de   :  { %v2573_v43 = vpop.f32.mrf.mxu1 }
 0x1e9   :  { %v2532_v48 = vpop.f32.mrf.mxu2 }
 0x1ea   :  { %v2533_v1 = vadd.f32 %v2532_v48, %v2520_v13  ;;  %v4710_v13 = vld [vmem:[%s5152_s11] sm:$0xff] }
 0x1eb   :  { %2934 = vmatpush.bf16.msrb.mxu3 %v4710_v13 }
 0x1f1   :  { %v2534_v37 = vpop.f32.mrf.mxu2 }
 0x1f9   :  { %v2584_v53 = vpop.f32.mrf.mxu2 }
 0x1fa   :  { %v2585_v6 = vadd.f32 %v2584_v53, %v2572_v32  ;;  %v4723_v32 = vld [vmem:[%s5151_s10] ss:$0 sm:$0xff] }
 0x201   :  { %v2586_v54 = vpop.f32.mrf.mxu2 }
 0x228   :  { %v2545_v2 = vpop.f32.mrf.mxu3 }
 0x229   :  { %v2546_v18 = vadd.f32 %v2545_v2, %v2533_v1 }
 0x22b   :  { %v2601_v3 = vmax.f32 %v2546_v18, 0.0 }
 0x22d   :  { %v2603_v4 = vpack.c.bf16 %v2601_v3, %v2601_v3 }
 0x22f   :  { %2745 = vmatmul.bf16.vlgmr.msra.gmra.mxu0 %v2603_v4 }
 0x230   :  { %v2547_v5 = vpop.f32.mrf.mxu3 }
 0x238   :  { %v2597_v7 = vpop.f32.mrf.mxu3 }
 0x239   :  { %v2598_v19 = vadd.f32 %v2597_v7, %v2585_v6 }
 0x23b   :  { %v2602_v26 = vmax.f32 %v2598_v19, 0.0 }
 0x23d   :  { %v2604_v20 = vpack.c.bf16 %v2602_v26, %v2602_v26 }
 0x23f   :  { %2758 = vmatmul.bf16.vlgmr.msra.gmra.mxu1 %v2604_v20 }
 0x240   :  { %v2599_v22 = vpop.f32.mrf.mxu3 }
 0x2ac   :  { %v2746_v16 = vpop.f32.mrf.mxu0 }
 0x2ad   :  { %v2747_v23 = vadd.f32 %v4721_v21, %v2746_v16 }
 0x2b4   :  { %v2748_v17 = vpop.f32.mrf.mxu0 }
 0x2bc   :  { %v2759_v25 = vpop.f32.mrf.mxu1 }
 0x2bd   :  { %v2760_v27 = vadd.f32 %v2759_v25, %v2747_v23 }
 0x2bf   :  { %v2763_v8 = vmax.f32 %v2760_v27, 0.0 }
 0x2c1   :  { %v2764_v28 = vpack.c.bf16 %v2763_v8, %v2763_v8 }
 0x2c3   :  { %2841 = vmatmul.bf16.vlgmr.msra.gmra.mxu2 %v2764_v28 }
 0x2c4   :  { %v2761_v29 = vpop.f32.mrf.mxu1 }
 0x346   :  { %v2842_v34 = vpop.f32.mrf.mxu2 }
 0x347   :  { %v2843_v35 = vadd.f32 %v4722_v33, %v2842_v34 }
 0x349   :  { %v2846_v36 = vmax.f32 %v2843_v35, 0.0 }
 0x34b   :  { %v2847_v41 = vpack.c.bf16 %v2846_v36, %v2846_v36 }
 0x34d   :  { %4352 = vmatmul.msk.bf16.vlgmr.msra.gmra.mxu3 %vm2884_vm0, %v2847_v41 }
 0x34e   :  { %v2844_v39 = vpop.f32.mrf.mxu2 }
 0x3d0   :  { %v2897_v24 = vpop.f32.mrf.mxu3 }
 0x3d1   :  { %v2898_v43 = vadd.f32 %v4723_v32, %v2897_v24 }
 0x3d3   :  { %v2901_v45 = vmax.f32 %v2898_v43, 0.0 }
 0x3d5   :  { %v2902_v44 = vpack.c.bf16 %v2901_v45, %v2901_v45 }
 0x3d7   :  { %4361 = vmatmul.msk.bf16.vlgmr.msrb.gmra.mxu3 %vm2923_vm1, %v2902_v44 }
 0x3d8   :  { %v2899_v38 = vpop.f32.mrf.mxu3 }
 0x45a   :  { %v2936_v42 = vpop.f32.mrf.mxu3 }
 0x45b   :  { %v2937_v48 = vadd.f32 %v4724_v52, %v2936_v42 }
 0x45d   :  { %2940 = vst [vmem:[#allocation10] sm:$0xff] %v2937_v48 }
 0x45e   :  { %2951 = dma.vmem_to_hbm [thread:$0]  %s2947_s3, 128, %s2949_s14, [#allocation4]  }
 0x462   :  { %v2938_v49 = vpop.f32.mrf.mxu3 }
 0x463   :  { %4852 = dma.done.wait [#allocation4], 128  }
 0x464   :  { %4853 = vsyncadd [#allocation4], 4294967168 }
 0x465   :  { %2956 = vsyncpa [#allocation3], 1 }
 0x466   :  { %2957 = vsyncpa [#allocation6], 1 }
 0x467   :  { %2958 = vsyncpa [#allocation9], 1 }
 0x468   :  { %2959 = vsyncpa [#allocation4], 1 }

</bundles_post_ra>
